<compile_context>
chip_gen: v7x
topology: tpu7x:2x2x1
jax: 0.10.0
libtpu: 0.0.40
codegen_flags: <defaults>
</compile_context>

<pallas_src>
import jax
import jax.numpy as jnp
from jax import lax
from jax.experimental import pallas as pl
from jax.experimental.pallas import tpu as pltpu

BN_EPS = 1e-5
CONV_TILE = 4096          # target lane-tile for the conv-GEMM M axis
HEAD_TILE = 512           # target lane-tile for the head's batch axis
VMEM_BUDGET = 32 * 1024 * 1024   # explicit budget; safe on v5e/v6e/v7x


# ---------------------------------------------------------------- helpers ---

def _round_up(x, m):
    return ((x + m - 1) // m) * m


def _pick_tile(m, target):
    """Largest 128-multiple tile: `target` if m >= target, else round_up(m,128)."""
    return target if m >= target else _round_up(m, 128)


def im2col_t(x, k=3, stride=2, pad=1):
    """x: (C, H, W, N) -> patches (k*k*C, HO*WO*N).

    Row order (kh, kw, c); column order (ho, wo, n).  Pure pad + strided slice
    + stack in XLA (no big transposes)."""
    C, H, W, N = x.shape
    xp = jnp.pad(x, ((0, 0), (pad, pad), (pad, pad), (0, 0)))
    HO = (H + 2 * pad - k) // stride + 1
    WO = (W + 2 * pad - k) // stride + 1
    slabs = []
    for kh in range(k):
        for kw in range(k):
            slabs.append(xp[:, kh:kh + stride * HO:stride,
                            kw:kw + stride * WO:stride, :])       # (C, HO, WO, N)
    p = jnp.stack(slabs, axis=0)                                  # (k*k, C, HO, WO, N)
    return p.reshape(k * k * C, HO * WO * N), HO, WO


# ---------------------------------------------------------------- kernels ---

def make_conv_stats_kernel(m_real, n_pad):
    """Conv GEMM (lane-dense) + bias, tiled over M, with two-phase BN stats.

    Accumulates per-channel sum/sumsq in VMEM scratch; at the last grid step
    emits folded BN scale/shift (single-FMA BN for the consumer).  Host-padded
    zero patch columns contribute exactly `bias` per channel, which is
    subtracted analytically (n_pad is static)."""
    inv_m = 1.0 / float(m_real)

    def kernel(p_ref, w_ref, b_ref, g_ref, bt_ref,
               y_ref, sc_ref, sh_ref, s_acc, q_acc):
        i = pl.program_id(0)

        @pl.when(i == 0)
        def _init():
            s_acc[...] = jnp.zeros_like(s_acc)
            q_acc[...] = jnp.zeros_like(q_acc)
            sc_ref[...] = jnp.zeros_like(sc_ref)
            sh_ref[...] = jnp.zeros_like(sh_ref)

        # (C, K) @ (K, tile) -> (C, tile): M on lanes, dense stores.
        y = jnp.dot(w_ref[...], p_ref[...],
                    preferred_element_type=jnp.float32) + b_ref[...]
        y_ref[...] = y
        s_acc[...] += jnp.sum(y, axis=1, keepdims=True)
        q_acc[...] += jnp.sum(y * y, axis=1, keepdims=True)

        @pl.when(i == pl.num_programs(0) - 1)
        def _finalize():
            b = b_ref[...]
            s = s_acc[...] - n_pad * b                 # remove zero-pad columns (y == b there)
            q = q_acc[...] - n_pad * (b * b)
            mean = s * inv_m
            var = q * inv_m - mean * mean              # biased variance (PyTorch BN fwd)
            scale = g_ref[...] * lax.rsqrt(var + BN_EPS)
            sc_ref[...] = scale
            sh_ref[...] = bt_ref[...] - mean * scale

    return kernel


def head_kernel(z_ref, sc_ref, sh_ref, w1_ref, b1_ref, w2_ref, b2_ref,
                logit_ref, logp_ref):
    """Fused BN2(FMA)+ReLU + fc1 + fc2 + log_softmax on a (784, tile) slab."""
    a = jnp.maximum(z_ref[...] * sc_ref[...] + sh_ref[...], 0.0)   # (784, tile)
    h = jnp.dot(w1_ref[...], a,
                preferred_element_type=jnp.float32) + b1_ref[...]   # (32, tile)
    logits = jnp.dot(w2_ref[...], h,
                     preferred_element_type=jnp.float32) + b2_ref[...]  # (10, tile)
    logit_ref[...] = logits
    m = jnp.max(logits, axis=0, keepdims=True)
    s = logits - m
    lse = jnp.log(jnp.sum(jnp.exp(s), axis=0, keepdims=True))
    logp_ref[...] = s - lse                                         # log_softmax(dim=class)


# ------------------------------------------------------------- pallas glue --

def conv_stage(patches, m_real, w_ck, bias, gamma, beta, tile):
    """patches: (K, Mp) zero-padded so Mp % tile == 0.  Returns y(C,Mp), scale(C,1), shift(C,1)."""
    K, mp = patches.shape
    C = w_ck.shape[0]
    grid = mp // tile
    kern = make_conv_stats_kernel(m_real, mp - m_real)
    return pl.pallas_call(
        kern,
        out_shape=(jax.ShapeDtypeStruct((C, mp), jnp.float32),
                   jax.ShapeDtypeStruct((C, 1), jnp.float32),
                   jax.ShapeDtypeStruct((C, 1), jnp.float32)),
        grid_spec=pltpu.PrefetchScalarGridSpec(
            num_scalar_prefetch=0,
            grid=(grid,),
            in_specs=[
                pl.BlockSpec((K, tile), lambda i: (0, i)),
                pl.BlockSpec((C, K), lambda i: (0, 0)),
                pl.BlockSpec((C, 1), lambda i: (0, 0)),
                pl.BlockSpec((C, 1), lambda i: (0, 0)),
                pl.BlockSpec((C, 1), lambda i: (0, 0)),
            ],
            out_specs=(
                pl.BlockSpec((C, tile), lambda i: (0, i)),
                pl.BlockSpec((C, 1), lambda i: (0, 0)),
                pl.BlockSpec((C, 1), lambda i: (0, 0)),
            ),
            scratch_shapes=[pltpu.VMEM((C, 1), jnp.float32),
                            pltpu.VMEM((C, 1), jnp.float32)]),
        compiler_params=pltpu.CompilerParams(
            dimension_semantics=("arbitrary",),       # cross-tile stat accumulation
            vmem_limit_bytes=VMEM_BUDGET),
    )(patches, w_ck, bias, gamma, beta)


def mlp_head(z, sc_row, sh_row, w1, b1, w2, b2, tile):
    """z: (784, Np) zero-padded so Np % tile == 0.  Returns (logits^T, logprobs^T) = (10, Np) each."""
    feat, np_ = z.shape
    h1 = w1.shape[0]
    o = w2.shape[0]
    grid = np_ // tile
    return pl.pallas_call(
        head_kernel,
        out_shape=(jax.ShapeDtypeStruct((o, np_), jnp.float32),
                   jax.ShapeDtypeStruct((o, np_), jnp.float32)),
        grid_spec=pltpu.PrefetchScalarGridSpec(
            num_scalar_prefetch=0,
            grid=(grid,),
            in_specs=[
                pl.BlockSpec((feat, tile), lambda j: (0, j)),
                pl.BlockSpec((feat, 1), lambda j: (0, 0)),
                pl.BlockSpec((feat, 1), lambda j: (0, 0)),
                pl.BlockSpec((h1, feat), lambda j: (0, 0)),
                pl.BlockSpec((h1, 1), lambda j: (0, 0)),
                pl.BlockSpec((o, h1), lambda j: (0, 0)),
                pl.BlockSpec((o, 1), lambda j: (0, 0)),
            ],
            out_specs=(
                pl.BlockSpec((o, tile), lambda j: (0, j)),
                pl.BlockSpec((o, tile), lambda j: (0, j)),
            )),
        compiler_params=pltpu.CompilerParams(
            dimension_semantics=("parallel",),        # per-sample work: megacore-friendly
            vmem_limit_bytes=VMEM_BUDGET),
    )(z, sc_row, sh_row, w1, b1, w2, b2)


# ------------------------------------------------------------- full forward -

def net_forward(x, params):
    """x: (N, 1, 28, 28) NCHW float32. Returns dict like Net.forward(logit=True)."""
    N = x.shape[0]
    # Single layout change: put batch on the trailing (lane) axis for the whole net.
    xt = jnp.transpose(x.astype(jnp.float32), (1, 2, 3, 0))        # (1, 28, 28, N)

    # ---- conv1 (GEMM, tiled over M) + two-phase BN1 stats -------------------
    p1, h1, w1o = im2col_t(xt)                                     # (9, 196*N)
    m1 = p1.shape[1]
    t1 = _pick_tile(m1, CONV_TILE)
    p1 = jnp.pad(p1, ((0, 0), (0, _round_up(m1, t1) - m1)))
    wk1 = jnp.transpose(params["conv1_w"], (0, 2, 3, 1)).reshape(
        params["conv1_w"].shape[0], -1)                            # (6, 9), K-order (kh,kw,c)
    y1, sc1, sh1 = conv_stage(p1, m1, wk1,
                              params["conv1_b"].reshape(-1, 1),
                              params["bn1_g"].reshape(-1, 1),
                              params["bn1_b"].reshape(-1, 1), t1)

    # BN1 apply + ReLU: single XLA FMA (fuses into the im2col below).  It must
    # precede conv2's spatial zero-padding, so it cannot go inside the conv2 kernel.
    a1 = jnp.maximum(y1[:, :m1] * sc1 + sh1, 0.0).reshape(-1, h1, w1o, N)  # (6,14,14,N)

    # ---- conv2 (GEMM, tiled over M) + two-phase BN2 stats -------------------
    p2, h2, w2o = im2col_t(a1)                                     # (54, 49*N)
    m2 = p2.shape[1]
    t2 = _pick_tile(m2, CONV_TILE)
    p2 = jnp.pad(p2, ((0, 0), (0, _round_up(m2, t2) - m2)))
    wk2 = jnp.transpose(params["conv2_w"], (0, 2, 3, 1)).reshape(
        params["conv2_w"].shape[0], -1)                            # (16, 54)
    y2, sc2, sh2 = conv_stage(p2, m2, wk2,
                              params["conv2_b"].reshape(-1, 1),
                              params["bn2_g"].reshape(-1, 1),
                              params["bn2_b"].reshape(-1, 1), t2)

    # ---- fused head: BN2+ReLU + flatten + fc1 + fc2 + log_softmax -----------
    # (16, 49*N) with columns (ho,wo,n) reshapes *for free* to (784, N) whose row
    # index c*49+hw matches nn.Flatten(1) of NCHW, so fc weights are used as-is.
    z = y2[:, :m2].reshape(-1, N)                                  # (784, N)
    sc2r = jnp.repeat(sc2, h2 * w2o, axis=0)                       # (784, 1) per-row BN2 scale
    sh2r = jnp.repeat(sh2, h2 * w2o, axis=0)
    tn = _pick_tile(N, HEAD_TILE)
    zp = jnp.pad(z, ((0, 0), (0, _round_up(N, tn) - N)))
    logits_t, logp_t = mlp_head(zp, sc2r, sh2r,
                                params["fc1_w"], params["fc1_b"].reshape(-1, 1),
                                params["fc2_w"], params["fc2_b"].reshape(-1, 1), tn)
    logits = logits_t[:, :N].T
    logp = logp_t[:, :N].T
    return {"output": logp, "logit": logits}


# ------------------------------------------------------------- reference ----

def ref_forward(x, params):
    def conv(x, w, b):
        y = lax.conv_general_dilated(
            x, w, window_strides=(2, 2), padding=((1, 1), (1, 1)),
            dimension_numbers=("NCHW", "OIHW", "NCHW"))
        return y + b.reshape(1, -1, 1, 1)

    def bn_relu(y, g, b):
        m = y.mean(axis=(0, 2, 3), keepdims=True)
        v = ((y - m) ** 2).mean(axis=(0, 2, 3), keepdims=True)
        z = (y - m) / jnp.sqrt(v + BN_EPS) * g.reshape(1, -1, 1, 1) + b.reshape(1, -1, 1, 1)
        return jnp.maximum(z, 0.0)

    h = bn_relu(conv(x, params["conv1_w"], params["conv1_b"]),
                params["bn1_g"], params["bn1_b"])
    h = bn_relu(conv(h, params["conv2_w"], params["conv2_b"]),
                params["bn2_g"], params["bn2_b"])
    z = h.reshape(x.shape[0], -1)
    z = z @ params["fc1_w"].T + params["fc1_b"]
    logits = z @ params["fc2_w"].T + params["fc2_b"]
    return jax.nn.log_softmax(logits, axis=1), logits


# ------------------------------------------------------------------ main ----

def init_params(key):
    ks = jax.random.split(key, 8)
    return {
        "conv1_w": 0.2 * jax.random.normal(ks[0], (6, 1, 3, 3), jnp.float32),
        "conv1_b": 0.1 * jax.random.normal(ks[1], (6,), jnp.float32),
        "bn1_g": jnp.ones((6,), jnp.float32),
        "bn1_b": jnp.zeros((6,), jnp.float32),
        "conv2_w": 0.2 * jax.random.normal(ks[2], (16, 6, 3, 3), jnp.float32),
        "conv2_b": 0.1 * jax.random.normal(ks[3], (16,), jnp.float32),
        "bn2_g": jnp.ones((16,), jnp.float32),
        "bn2_b": jnp.zeros((16,), jnp.float32),
        "fc1_w": 0.05 * jax.random.normal(ks[4], (32, 784), jnp.float32),
        "fc1_b": 0.05 * jax.random.normal(ks[5], (32,), jnp.float32),
        "fc2_w": 0.1 * jax.random.normal(ks[6], (10, 32), jnp.float32),
        "fc2_b": 0.1 * jax.random.normal(ks[7], (10,), jnp.float32),
    }


if __name__ == "__main__":
    key = jax.random.PRNGKey(0)
    kx, kp = jax.random.split(key)
    x = jax.random.normal(kx, (2, 1, 28, 28), jnp.float32)   # MNIST-shaped batch
    params = init_params(kp)

    out = jax.jit(net_forward)(x, params)
    jax.block_until_ready(out)

    ref_logp, ref_logits = ref_forward(x, params)
    assert out["output"].shape == (2, 10) and out["logit"].shape == (2, 10)
    assert float(jnp.max(jnp.abs(out["logit"] - ref_logits))) < 1e-2
    assert float(jnp.max(jnp.abs(out["output"] - ref_logp))) < 1e-2

    print("KERNEL_OK")
</pallas_src>

<mosaic_0001>
module attributes {stable_mosaic.version = 11 : i64} {
  func.func @kernel(%arg0: i32, %arg1: memref<9x512xf32, #tpu.memory_space<vmem>>, %arg2: memref<6x9xf32, #tpu.memory_space<vmem>>, %arg3: memref<6x1xf32, #tpu.memory_space<vmem>>, %arg4: memref<6x1xf32, #tpu.memory_space<vmem>>, %arg5: memref<6x1xf32, #tpu.memory_space<vmem>>, %arg6: memref<6x512xf32, #tpu.memory_space<vmem>>, %arg7: memref<6x1xf32, #tpu.memory_space<vmem>>, %arg8: memref<6x1xf32, #tpu.memory_space<vmem>>, %arg9: memref<6x1xf32, #tpu.memory_space<vmem>>, %arg10: memref<6x1xf32, #tpu.memory_space<vmem>>) attributes {dimension_semantics = [#tpu.dimension_semantics<arbitrary>], iteration_bounds = array<i64: 1>, scalar_prefetch = 0 : i64, scratch_operands = 2 : i64, tpu.core_type = #tpu.core_type<tc>, window_params = [{transform_indices = @transform_0, window_bounds = array<i64: 9, 512>}, {pipeline_mode = #tpu.pipeline_mode<synchronous>, transform_indices = @transform_1, window_bounds = array<i64: 6, 9>}, {pipeline_mode = #tpu.pipeline_mode<synchronous>, transform_indices = @transform_2, window_bounds = array<i64: 6, 1>}, {pipeline_mode = #tpu.pipeline_mode<synchronous>, transform_indices = @transform_3, window_bounds = array<i64: 6, 1>}, {pipeline_mode = #tpu.pipeline_mode<synchronous>, transform_indices = @transform_4, window_bounds = array<i64: 6, 1>}, {transform_indices = @transform_5, window_bounds = array<i64: 6, 512>}, {pipeline_mode = #tpu.pipeline_mode<synchronous>, transform_indices = @transform_6, window_bounds = array<i64: 6, 1>}, {pipeline_mode = #tpu.pipeline_mode<synchronous>, transform_indices = @transform_7, window_bounds = array<i64: 6, 1>}]} {
    %c0_i32 = arith.constant 0 : i32
    %0 = arith.cmpi eq, %arg0, %c0_i32 : i32
    %1 = arith.extui %0 : i1 to i32
    %c0_i32_0 = arith.constant 0 : i32
    %2 = arith.cmpi ne, %1, %c0_i32_0 : i32
    scf.if %2 {
      %cst_20 = arith.constant 0.000000e+00 : f32
      %24 = vector.broadcast %cst_20 : f32 to vector<6x1xf32>
      %c0_21 = arith.constant 0 : index
      %c0_22 = arith.constant 0 : index
      %25 = vector.load %arg9[%c0_21, %c0_22] : memref<6x1xf32, #tpu.memory_space<vmem>>, vector<6x1xf32>
      tpu.vector_store %arg9[%c0_21, %c0_22], %24 {strides = array<i32>} : memref<6x1xf32, #tpu.memory_space<vmem>>, vector<6x1xf32>,
      %cst_23 = arith.constant 0.000000e+00 : f32
      %26 = vector.broadcast %cst_23 : f32 to vector<6x1xf32>
      %c0_24 = arith.constant 0 : index
      %c0_25 = arith.constant 0 : index
      %27 = vector.load %arg10[%c0_24, %c0_25] : memref<6x1xf32, #tpu.memory_space<vmem>>, vector<6x1xf32>
      tpu.vector_store %arg10[%c0_24, %c0_25], %26 {strides = array<i32>} : memref<6x1xf32, #tpu.memory_space<vmem>>, vector<6x1xf32>,
      %cst_26 = arith.constant 0.000000e+00 : f32
      %28 = vector.broadcast %cst_26 : f32 to vector<6x1xf32>
      %c0_27 = arith.constant 0 : index
      %c0_28 = arith.constant 0 : index
      %29 = vector.load %arg7[%c0_27, %c0_28] : memref<6x1xf32, #tpu.memory_space<vmem>>, vector<6x1xf32>
      tpu.vector_store %arg7[%c0_27, %c0_28], %28 {strides = array<i32>} : memref<6x1xf32, #tpu.memory_space<vmem>>, vector<6x1xf32>,
      %cst_29 = arith.constant 0.000000e+00 : f32
      %30 = vector.broadcast %cst_29 : f32 to vector<6x1xf32>
      %c0_30 = arith.constant 0 : index
      %c0_31 = arith.constant 0 : index
      %31 = vector.load %arg8[%c0_30, %c0_31] : memref<6x1xf32, #tpu.memory_space<vmem>>, vector<6x1xf32>
      tpu.vector_store %arg8[%c0_30, %c0_31], %30 {strides = array<i32>} : memref<6x1xf32, #tpu.memory_space<vmem>>, vector<6x1xf32>,
    } else {
    }
    %c0 = arith.constant 0 : index
    %c0_1 = arith.constant 0 : index
    %3 = vector.load %arg2[%c0, %c0_1] : memref<6x9xf32, #tpu.memory_space<vmem>>, vector<6x9xf32>
    %c0_2 = arith.constant 0 : index
    %c0_3 = arith.constant 0 : index
    %4 = vector.load %arg1[%c0_2, %c0_3] : memref<9x512xf32, #tpu.memory_space<vmem>>, vector<9x512xf32>
    %cst = arith.constant dense<0.000000e+00> : vector<6x512xf32>
    %5 = tpu.matmul %3, %4, %cst {dimension_numbers = #tpu.dot_dimension_numbers<[1], [0], [0], [1], [0, 0, 1, 1], [], []>} : vector<6x9xf32>, vector<9x512xf32>, vector<6x512xf32> -> vector<6x512xf32>
    %c0_4 = arith.constant 0 : index
    %c0_5 = arith.constant 0 : index
    %6 = vector.load %arg3[%c0_4, %c0_5] : memref<6x1xf32, #tpu.memory_space<vmem>>, vector<6x1xf32>
    %7 = vector.broadcast %6 : vector<6x1xf32> to vector<6x512xf32>
    %8 = arith.addf %5, %7 : vector<6x512xf32>
    %c0_6 = arith.constant 0 : index
    %c0_7 = arith.constant 0 : index
    %9 = vector.load %arg6[%c0_6, %c0_7] : memref<6x512xf32, #tpu.memory_space<vmem>>, vector<6x512xf32>
    tpu.vector_store %arg6[%c0_6, %c0_7], %8 {strides = array<i32>} : memref<6x512xf32, #tpu.memory_space<vmem>>, vector<6x512xf32>,
    %c0_8 = arith.constant 0 : index
    %c0_9 = arith.constant 0 : index
    %10 = vector.load %arg9[%c0_8, %c0_9] : memref<6x1xf32, #tpu.memory_space<vmem>>, vector<6x1xf32>
    %cst_10 = arith.constant dense<0.000000e+00> : vector<6xf32>
    %11 = vector.multi_reduction <add>, %8, %cst_10 [1] : vector<6x512xf32> to vector<6xf32>
    %12 = vector.shape_cast %11 : vector<6xf32> to vector<6x1xf32>
    %13 = arith.addf %10, %12 : vector<6x1xf32>
    %c0_11 = arith.constant 0 : index
    %c0_12 = arith.constant 0 : index
    %14 = vector.load %arg9[%c0_11, %c0_12] : memref<6x1xf32, #tpu.memory_space<vmem>>, vector<6x1xf32>
    tpu.vector_store %arg9[%c0_11, %c0_12], %13 {strides = array<i32>} : memref<6x1xf32, #tpu.memory_space<vmem>>, vector<6x1xf32>,
    %c0_13 = arith.constant 0 : index
    %c0_14 = arith.constant 0 : index
    %15 = vector.load %arg10[%c0_13, %c0_14] : memref<6x1xf32, #tpu.memory_space<vmem>>, vector<6x1xf32>
    %16 = arith.mulf %8, %8 : vector<6x512xf32>
    %cst_15 = arith.constant dense<0.000000e+00> : vector<6xf32>
    %17 = vector.multi_reduction <add>, %16, %cst_15 [1] : vector<6x512xf32> to vector<6xf32>
    %18 = vector.shape_cast %17 : vector<6xf32> to vector<6x1xf32>
    %19 = arith.addf %15, %18 : vector<6x1xf32>
    %c0_16 = arith.constant 0 : index
    %c0_17 = arith.constant 0 : index
    %20 = vector.load %arg10[%c0_16, %c0_17] : memref<6x1xf32, #tpu.memory_space<vmem>>, vector<6x1xf32>
    tpu.vector_store %arg10[%c0_16, %c0_17], %19 {strides = array<i32>} : memref<6x1xf32, #tpu.memory_space<vmem>>, vector<6x1xf32>,
    %c0_i32_18 = arith.constant 0 : i32
    %21 = arith.cmpi eq, %arg0, %c0_i32_18 : i32
    %22 = arith.extui %21 : i1 to i32
    %c0_i32_19 = arith.constant 0 : i32
    %23 = arith.cmpi ne, %22, %c0_i32_19 : i32
    scf.if %23 {
      %c0_20 = arith.constant 0 : index
      %c0_21 = arith.constant 0 : index
      %24 = vector.load %arg3[%c0_20, %c0_21] : memref<6x1xf32, #tpu.memory_space<vmem>>, vector<6x1xf32>
      %c0_22 = arith.constant 0 : index
      %c0_23 = arith.constant 0 : index
      %25 = vector.load %arg9[%c0_22, %c0_23] : memref<6x1xf32, #tpu.memory_space<vmem>>, vector<6x1xf32>
      %cst_24 = arith.constant 1.200000e+02 : f32
      %26 = vector.broadcast %cst_24 : f32 to vector<6x1xf32>
      %27 = arith.mulf %26, %24 : vector<6x1xf32>
      %28 = arith.subf %25, %27 : vector<6x1xf32>
      %c0_25 = arith.constant 0 : index
      %c0_26 = arith.constant 0 : index
      %29 = vector.load %arg10[%c0_25, %c0_26] : memref<6x1xf32, #tpu.memory_space<vmem>>, vector<6x1xf32>
      %30 = arith.mulf %24, %24 : vector<6x1xf32>
      %cst_27 = arith.constant 1.200000e+02 : f32
      %31 = vector.broadcast %cst_27 : f32 to vector<6x1xf32>
      %32 = arith.mulf %31, %30 : vector<6x1xf32>
      %33 = arith.subf %29, %32 : vector<6x1xf32>
      %cst_28 = arith.constant 0.00255102036 : f32
      %34 = vector.broadcast %cst_28 : f32 to vector<6x1xf32>
      %35 = arith.mulf %28, %34 : vector<6x1xf32>
      %cst_29 = arith.constant 0.00255102036 : f32
      %36 = vector.broadcast %cst_29 : f32 to vector<6x1xf32>
      %37 = arith.mulf %33, %36 : vector<6x1xf32>
      %38 = arith.mulf %35, %35 : vector<6x1xf32>
      %39 = arith.subf %37, %38 : vector<6x1xf32>
      %c0_30 = arith.constant 0 : index
      %c0_31 = arith.constant 0 : index
      %40 = vector.load %arg4[%c0_30, %c0_31] : memref<6x1xf32, #tpu.memory_space<vmem>>, vector<6x1xf32>
      %cst_32 = arith.constant 9.99999974E-6 : f32
      %41 = vector.broadcast %cst_32 : f32 to vector<6x1xf32>
      %42 = arith.addf %39, %41 : vector<6x1xf32>
      %43 = math.rsqrt %42 : vector<6x1xf32>
      %44 = arith.mulf %40, %43 : vector<6x1xf32>
      %c0_33 = arith.constant 0 : index
      %c0_34 = arith.constant 0 : index
      %45 = vector.load %arg7[%c0_33, %c0_34] : memref<6x1xf32, #tpu.memory_space<vmem>>, vector<6x1xf32>
      tpu.vector_store %arg7[%c0_33, %c0_34], %44 {strides = array<i32>} : memref<6x1xf32, #tpu.memory_space<vmem>>, vector<6x1xf32>,
      %c0_35 = arith.constant 0 : index
      %c0_36 = arith.constant 0 : index
      %46 = vector.load %arg5[%c0_35, %c0_36] : memref<6x1xf32, #tpu.memory_space<vmem>>, vector<6x1xf32>
      %47 = arith.mulf %35, %44 : vector<6x1xf32>
      %48 = arith.subf %46, %47 : vector<6x1xf32>
      %c0_37 = arith.constant 0 : index
      %c0_38 = arith.constant 0 : index
      %49 = vector.load %arg8[%c0_37, %c0_38] : memref<6x1xf32, #tpu.memory_space<vmem>>, vector<6x1xf32>
      tpu.vector_store %arg8[%c0_37, %c0_38], %48 {strides = array<i32>} : memref<6x1xf32, #tpu.memory_space<vmem>>, vector<6x1xf32>,
    } else {
    }
    return
  }
  func.func @transform_0(%arg0: i32) -> (i32, i32) {
    %c0_i32 = arith.constant 0 : i32
    %c0_i32_0 = arith.constant 0 : i32
    return %c0_i32, %arg0 : i32, i32
  }
  func.func @transform_1(%arg0: i32) -> (i32, i32) {
    %c0_i32 = arith.constant 0 : i32
    %c0_i32_0 = arith.constant 0 : i32
    %c0_i32_1 = arith.constant 0 : i32
    return %c0_i32, %c0_i32_0 : i32, i32
  }
  func.func @transform_2(%arg0: i32) -> (i32, i32) {
    %c0_i32 = arith.constant 0 : i32
    %c0_i32_0 = arith.constant 0 : i32
    %c0_i32_1 = arith.constant 0 : i32
    return %c0_i32, %c0_i32_0 : i32, i32
  }
  func.func @transform_3(%arg0: i32) -> (i32, i32) {
    %c0_i32 = arith.constant 0 : i32
    %c0_i32_0 = arith.constant 0 : i32
    %c0_i32_1 = arith.constant 0 : i32
    return %c0_i32, %c0_i32_0 : i32, i32
  }
  func.func @transform_4(%arg0: i32) -> (i32, i32) {
    %c0_i32 = arith.constant 0 : i32
    %c0_i32_0 = arith.constant 0 : i32
    %c0_i32_1 = arith.constant 0 : i32
    return %c0_i32, %c0_i32_0 : i32, i32
  }
  func.func @transform_5(%arg0: i32) -> (i32, i32) {
    %c0_i32 = arith.constant 0 : i32
    %c0_i32_0 = arith.constant 0 : i32
    return %c0_i32, %arg0 : i32, i32
  }
  func.func @transform_6(%arg0: i32) -> (i32, i32) {
    %c0_i32 = arith.constant 0 : i32
    %c0_i32_0 = arith.constant 0 : i32
    %c0_i32_1 = arith.constant 0 : i32
    return %c0_i32, %c0_i32_0 : i32, i32
  }
  func.func @transform_7(%arg0: i32) -> (i32, i32) {
    %c0_i32 = arith.constant 0 : i32
    %c0_i32_0 = arith.constant 0 : i32
    %c0_i32_1 = arith.constant 0 : i32
    return %c0_i32, %c0_i32_0 : i32, i32
  }
}

module attributes {stable_mosaic.version = 11 : i64} {
  func.func @kernel(%arg0: i32, %arg1: memref<54x128xf32, #tpu.memory_space<vmem>>, %arg2: memref<16x54xf32, #tpu.memory_space<vmem>>, %arg3: memref<16x1xf32, #tpu.memory_space<vmem>>, %arg4: memref<16x1xf32, #tpu.memory_space<vmem>>, %arg5: memref<16x1xf32, #tpu.memory_space<vmem>>, %arg6: memref<16x128xf32, #tpu.memory_space<vmem>>, %arg7: memref<16x1xf32, #tpu.memory_space<vmem>>, %arg8: memref<16x1xf32, #tpu.memory_space<vmem>>, %arg9: memref<16x1xf32, #tpu.memory_space<vmem>>, %arg10: memref<16x1xf32, #tpu.memory_space<vmem>>) attributes {dimension_semantics = [#tpu.dimension_semantics<arbitrary>], iteration_bounds = array<i64: 1>, scalar_prefetch = 0 : i64, scratch_operands = 2 : i64, tpu.core_type = #tpu.core_type<tc>, window_params = [{transform_indices = @transform_0, window_bounds = array<i64: 54, 128>}, {pipeline_mode = #tpu.pipeline_mode<synchronous>, transform_indices = @transform_1, window_bounds = array<i64: 16, 54>}, {pipeline_mode = #tpu.pipeline_mode<synchronous>, transform_indices = @transform_2, window_bounds = array<i64: 16, 1>}, {pipeline_mode = #tpu.pipeline_mode<synchronous>, transform_indices = @transform_3, window_bounds = array<i64: 16, 1>}, {pipeline_mode = #tpu.pipeline_mode<synchronous>, transform_indices = @transform_4, window_bounds = array<i64: 16, 1>}, {transform_indices = @transform_5, window_bounds = array<i64: 16, 128>}, {pipeline_mode = #tpu.pipeline_mode<synchronous>, transform_indices = @transform_6, window_bounds = array<i64: 16, 1>}, {pipeline_mode = #tpu.pipeline_mode<synchronous>, transform_indices = @transform_7, window_bounds = array<i64: 16, 1>}]} {
    %c0_i32 = arith.constant 0 : i32
    %0 = arith.cmpi eq, %arg0, %c0_i32 : i32
    %1 = arith.extui %0 : i1 to i32
    %c0_i32_0 = arith.constant 0 : i32
    %2 = arith.cmpi ne, %1, %c0_i32_0 : i32
    scf.if %2 {
      %cst_20 = arith.constant 0.000000e+00 : f32
      %24 = vector.broadcast %cst_20 : f32 to vector<16x1xf32>
      %c0_21 = arith.constant 0 : index
      %c0_22 = arith.constant 0 : index
      %25 = vector.load %arg9[%c0_21, %c0_22] : memref<16x1xf32, #tpu.memory_space<vmem>>, vector<16x1xf32>
      tpu.vector_store %arg9[%c0_21, %c0_22], %24 {strides = array<i32>} : memref<16x1xf32, #tpu.memory_space<vmem>>, vector<16x1xf32>,
      %cst_23 = arith.constant 0.000000e+00 : f32
      %26 = vector.broadcast %cst_23 : f32 to vector<16x1xf32>
      %c0_24 = arith.constant 0 : index
      %c0_25 = arith.constant 0 : index
      %27 = vector.load %arg10[%c0_24, %c0_25] : memref<16x1xf32, #tpu.memory_space<vmem>>, vector<16x1xf32>
      tpu.vector_store %arg10[%c0_24, %c0_25], %26 {strides = array<i32>} : memref<16x1xf32, #tpu.memory_space<vmem>>, vector<16x1xf32>,
      %cst_26 = arith.constant 0.000000e+00 : f32
      %28 = vector.broadcast %cst_26 : f32 to vector<16x1xf32>
      %c0_27 = arith.constant 0 : index
      %c0_28 = arith.constant 0 : index
      %29 = vector.load %arg7[%c0_27, %c0_28] : memref<16x1xf32, #tpu.memory_space<vmem>>, vector<16x1xf32>
      tpu.vector_store %arg7[%c0_27, %c0_28], %28 {strides = array<i32>} : memref<16x1xf32, #tpu.memory_space<vmem>>, vector<16x1xf32>,
      %cst_29 = arith.constant 0.000000e+00 : f32
      %30 = vector.broadcast %cst_29 : f32 to vector<16x1xf32>
      %c0_30 = arith.constant 0 : index
      %c0_31 = arith.constant 0 : index
      %31 = vector.load %arg8[%c0_30, %c0_31] : memref<16x1xf32, #tpu.memory_space<vmem>>, vector<16x1xf32>
      tpu.vector_store %arg8[%c0_30, %c0_31], %30 {strides = array<i32>} : memref<16x1xf32, #tpu.memory_space<vmem>>, vector<16x1xf32>,
    } else {
    }
    %c0 = arith.constant 0 : index
    %c0_1 = arith.constant 0 : index
    %3 = vector.load %arg2[%c0, %c0_1] : memref<16x54xf32, #tpu.memory_space<vmem>>, vector<16x54xf32>
    %c0_2 = arith.constant 0 : index
    %c0_3 = arith.constant 0 : index
    %4 = vector.load %arg1[%c0_2, %c0_3] : memref<54x128xf32, #tpu.memory_space<vmem>>, vector<54x128xf32>
    %cst = arith.constant dense<0.000000e+00> : vector<16x128xf32>
    %5 = tpu.matmul %3, %4, %cst {dimension_numbers = #tpu.dot_dimension_numbers<[1], [0], [0], [1], [0, 0, 1, 1], [], []>} : vector<16x54xf32>, vector<54x128xf32>, vector<16x128xf32> -> vector<16x128xf32>
    %c0_4 = arith.constant 0 : index
    %c0_5 = arith.constant 0 : index
    %6 = vector.load %arg3[%c0_4, %c0_5] : memref<16x1xf32, #tpu.memory_space<vmem>>, vector<16x1xf32>
    %7 = vector.broadcast %6 : vector<16x1xf32> to vector<16x128xf32>
    %8 = arith.addf %5, %7 : vector<16x128xf32>
    %c0_6 = arith.constant 0 : index
    %c0_7 = arith.constant 0 : index
    %9 = vector.load %arg6[%c0_6, %c0_7] : memref<16x128xf32, #tpu.memory_space<vmem>>, vector<16x128xf32>
    tpu.vector_store %arg6[%c0_6, %c0_7], %8 {strides = array<i32>} : memref<16x128xf32, #tpu.memory_space<vmem>>, vector<16x128xf32>,
    %c0_8 = arith.constant 0 : index
    %c0_9 = arith.constant 0 : index
    %10 = vector.load %arg9[%c0_8, %c0_9] : memref<16x1xf32, #tpu.memory_space<vmem>>, vector<16x1xf32>
    %cst_10 = arith.constant dense<0.000000e+00> : vector<16xf32>
    %11 = vector.multi_reduction <add>, %8, %cst_10 [1] : vector<16x128xf32> to vector<16xf32>
    %12 = vector.shape_cast %11 : vector<16xf32> to vector<16x1xf32>
    %13 = arith.addf %10, %12 : vector<16x1xf32>
    %c0_11 = arith.constant 0 : index
    %c0_12 = arith.constant 0 : index
    %14 = vector.load %arg9[%c0_11, %c0_12] : memref<16x1xf32, #tpu.memory_space<vmem>>, vector<16x1xf32>
    tpu.vector_store %arg9[%c0_11, %c0_12], %13 {strides = array<i32>} : memref<16x1xf32, #tpu.memory_space<vmem>>, vector<16x1xf32>,
    %c0_13 = arith.constant 0 : index
    %c0_14 = arith.constant 0 : index
    %15 = vector.load %arg10[%c0_13, %c0_14] : memref<16x1xf32, #tpu.memory_space<vmem>>, vector<16x1xf32>
    %16 = arith.mulf %8, %8 : vector<16x128xf32>
    %cst_15 = arith.constant dense<0.000000e+00> : vector<16xf32>
    %17 = vector.multi_reduction <add>, %16, %cst_15 [1] : vector<16x128xf32> to vector<16xf32>
    %18 = vector.shape_cast %17 : vector<16xf32> to vector<16x1xf32>
    %19 = arith.addf %15, %18 : vector<16x1xf32>
    %c0_16 = arith.constant 0 : index
    %c0_17 = arith.constant 0 : index
    %20 = vector.load %arg10[%c0_16, %c0_17] : memref<16x1xf32, #tpu.memory_space<vmem>>, vector<16x1xf32>
    tpu.vector_store %arg10[%c0_16, %c0_17], %19 {strides = array<i32>} : memref<16x1xf32, #tpu.memory_space<vmem>>, vector<16x1xf32>,
    %c0_i32_18 = arith.constant 0 : i32
    %21 = arith.cmpi eq, %arg0, %c0_i32_18 : i32
    %22 = arith.extui %21 : i1 to i32
    %c0_i32_19 = arith.constant 0 : i32
    %23 = arith.cmpi ne, %22, %c0_i32_19 : i32
    scf.if %23 {
      %c0_20 = arith.constant 0 : index
      %c0_21 = arith.constant 0 : index
      %24 = vector.load %arg3[%c0_20, %c0_21] : memref<16x1xf32, #tpu.memory_space<vmem>>, vector<16x1xf32>
      %c0_22 = arith.constant 0 : index
      %c0_23 = arith.constant 0 : index
      %25 = vector.load %arg9[%c0_22, %c0_23] : memref<16x1xf32, #tpu.memory_space<vmem>>, vector<16x1xf32>
      %cst_24 = arith.constant 3.000000e+01 : f32
      %26 = vector.broadcast %cst_24 : f32 to vector<16x1xf32>
      %27 = arith.mulf %26, %24 : vector<16x1xf32>
      %28 = arith.subf %25, %27 : vector<16x1xf32>
      %c0_25 = arith.constant 0 : index
      %c0_26 = arith.constant 0 : index
      %29 = vector.load %arg10[%c0_25, %c0_26] : memref<16x1xf32, #tpu.memory_space<vmem>>, vector<16x1xf32>
      %30 = arith.mulf %24, %24 : vector<16x1xf32>
      %cst_27 = arith.constant 3.000000e+01 : f32
      %31 = vector.broadcast %cst_27 : f32 to vector<16x1xf32>
      %32 = arith.mulf %31, %30 : vector<16x1xf32>
      %33 = arith.subf %29, %32 : vector<16x1xf32>
      %cst_28 = arith.constant 0.0102040814 : f32
      %34 = vector.broadcast %cst_28 : f32 to vector<16x1xf32>
      %35 = arith.mulf %28, %34 : vector<16x1xf32>
      %cst_29 = arith.constant 0.0102040814 : f32
      %36 = vector.broadcast %cst_29 : f32 to vector<16x1xf32>
      %37 = arith.mulf %33, %36 : vector<16x1xf32>
      %38 = arith.mulf %35, %35 : vector<16x1xf32>
      %39 = arith.subf %37, %38 : vector<16x1xf32>
      %c0_30 = arith.constant 0 : index
      %c0_31 = arith.constant 0 : index
      %40 = vector.load %arg4[%c0_30, %c0_31] : memref<16x1xf32, #tpu.memory_space<vmem>>, vector<16x1xf32>
      %cst_32 = arith.constant 9.99999974E-6 : f32
      %41 = vector.broadcast %cst_32 : f32 to vector<16x1xf32>
      %42 = arith.addf %39, %41 : vector<16x1xf32>
      %43 = math.rsqrt %42 : vector<16x1xf32>
      %44 = arith.mulf %40, %43 : vector<16x1xf32>
      %c0_33 = arith.constant 0 : index
      %c0_34 = arith.constant 0 : index
      %45 = vector.load %arg7[%c0_33, %c0_34] : memref<16x1xf32, #tpu.memory_space<vmem>>, vector<16x1xf32>
      tpu.vector_store %arg7[%c0_33, %c0_34], %44 {strides = array<i32>} : memref<16x1xf32, #tpu.memory_space<vmem>>, vector<16x1xf32>,
      %c0_35 = arith.constant 0 : index
      %c0_36 = arith.constant 0 : index
      %46 = vector.load %arg5[%c0_35, %c0_36] : memref<16x1xf32, #tpu.memory_space<vmem>>, vector<16x1xf32>
      %47 = arith.mulf %35, %44 : vector<16x1xf32>
      %48 = arith.subf %46, %47 : vector<16x1xf32>
      %c0_37 = arith.constant 0 : index
      %c0_38 = arith.constant 0 : index
      %49 = vector.load %arg8[%c0_37, %c0_38] : memref<16x1xf32, #tpu.memory_space<vmem>>, vector<16x1xf32>
      tpu.vector_store %arg8[%c0_37, %c0_38], %48 {strides = array<i32>} : memref<16x1xf32, #tpu.memory_space<vmem>>, vector<16x1xf32>,
    } else {
    }
    return
  }
  func.func @transform_0(%arg0: i32) -> (i32, i32) {
    %c0_i32 = arith.constant 0 : i32
    %c0_i32_0 = arith.constant 0 : i32
    return %c0_i32, %arg0 : i32, i32
  }
  func.func @transform_1(%arg0: i32) -> (i32, i32) {
    %c0_i32 = arith.constant 0 : i32
    %c0_i32_0 = arith.constant 0 : i32
    %c0_i32_1 = arith.constant 0 : i32
    return %c0_i32, %c0_i32_0 : i32, i32
  }
  func.func @transform_2(%arg0: i32) -> (i32, i32) {
    %c0_i32 = arith.constant 0 : i32
    %c0_i32_0 = arith.constant 0 : i32
    %c0_i32_1 = arith.constant 0 : i32
    return %c0_i32, %c0_i32_0 : i32, i32
  }
  func.func @transform_3(%arg0: i32) -> (i32, i32) {
    %c0_i32 = arith.constant 0 : i32
    %c0_i32_0 = arith.constant 0 : i32
    %c0_i32_1 = arith.constant 0 : i32
    return %c0_i32, %c0_i32_0 : i32, i32
  }
  func.func @transform_4(%arg0: i32) -> (i32, i32) {
    %c0_i32 = arith.constant 0 : i32
    %c0_i32_0 = arith.constant 0 : i32
    %c0_i32_1 = arith.constant 0 : i32
    return %c0_i32, %c0_i32_0 : i32, i32
  }
  func.func @transform_5(%arg0: i32) -> (i32, i32) {
    %c0_i32 = arith.constant 0 : i32
    %c0_i32_0 = arith.constant 0 : i32
    return %c0_i32, %arg0 : i32, i32
  }
  func.func @transform_6(%arg0: i32) -> (i32, i32) {
    %c0_i32 = arith.constant 0 : i32
    %c0_i32_0 = arith.constant 0 : i32
    %c0_i32_1 = arith.constant 0 : i32
    return %c0_i32, %c0_i32_0 : i32, i32
  }
  func.func @transform_7(%arg0: i32) -> (i32, i32) {
    %c0_i32 = arith.constant 0 : i32
    %c0_i32_0 = arith.constant 0 : i32
    %c0_i32_1 = arith.constant 0 : i32
    return %c0_i32, %c0_i32_0 : i32, i32
  }
}

module attributes {stable_mosaic.version = 11 : i64} {
  func.func @head_kernel(%arg0: i32, %arg1: memref<784x128xf32, #tpu.memory_space<vmem>>, %arg2: memref<784x1xf32, #tpu.memory_space<vmem>>, %arg3: memref<784x1xf32, #tpu.memory_space<vmem>>, %arg4: memref<32x784xf32, #tpu.memory_space<vmem>>, %arg5: memref<32x1xf32, #tpu.memory_space<vmem>>, %arg6: memref<10x32xf32, #tpu.memory_space<vmem>>, %arg7: memref<10x1xf32, #tpu.memory_space<vmem>>, %arg8: memref<10x128xf32, #tpu.memory_space<vmem>>, %arg9: memref<10x128xf32, #tpu.memory_space<vmem>>) attributes {dimension_semantics = [#tpu.dimension_semantics<parallel>], iteration_bounds = array<i64: 1>, scalar_prefetch = 0 : i64, scratch_operands = 0 : i64, tpu.core_type = #tpu.core_type<tc>, window_params = [{transform_indices = @transform_0, window_bounds = array<i64: 784, 128>}, {pipeline_mode = #tpu.pipeline_mode<synchronous>, transform_indices = @transform_1, window_bounds = array<i64: 784, 1>}, {pipeline_mode = #tpu.pipeline_mode<synchronous>, transform_indices = @transform_2, window_bounds = array<i64: 784, 1>}, {pipeline_mode = #tpu.pipeline_mode<synchronous>, transform_indices = @transform_3, window_bounds = array<i64: 32, 784>}, {pipeline_mode = #tpu.pipeline_mode<synchronous>, transform_indices = @transform_4, window_bounds = array<i64: 32, 1>}, {pipeline_mode = #tpu.pipeline_mode<synchronous>, transform_indices = @transform_5, window_bounds = array<i64: 10, 32>}, {pipeline_mode = #tpu.pipeline_mode<synchronous>, transform_indices = @transform_6, window_bounds = array<i64: 10, 1>}, {transform_indices = @transform_7, window_bounds = array<i64: 10, 128>}, {transform_indices = @transform_8, window_bounds = array<i64: 10, 128>}]} {
    %c0 = arith.constant 0 : index
    %c0_0 = arith.constant 0 : index
    %0 = vector.load %arg1[%c0, %c0_0] : memref<784x128xf32, #tpu.memory_space<vmem>>, vector<784x128xf32>
    %c0_1 = arith.constant 0 : index
    %c0_2 = arith.constant 0 : index
    %1 = vector.load %arg2[%c0_1, %c0_2] : memref<784x1xf32, #tpu.memory_space<vmem>>, vector<784x1xf32>
    %2 = vector.broadcast %1 : vector<784x1xf32> to vector<784x128xf32>
    %3 = arith.mulf %0, %2 : vector<784x128xf32>
    %c0_3 = arith.constant 0 : index
    %c0_4 = arith.constant 0 : index
    %4 = vector.load %arg3[%c0_3, %c0_4] : memref<784x1xf32, #tpu.memory_space<vmem>>, vector<784x1xf32>
    %5 = vector.broadcast %4 : vector<784x1xf32> to vector<784x128xf32>
    %6 = arith.addf %3, %5 : vector<784x128xf32>
    %cst = arith.constant 0.000000e+00 : f32
    %7 = vector.broadcast %cst : f32 to vector<784x128xf32>
    %8 = arith.maximumf %6, %7 : vector<784x128xf32>
    %c0_5 = arith.constant 0 : index
    %c0_6 = arith.constant 0 : index
    %9 = vector.load %arg4[%c0_5, %c0_6] : memref<32x784xf32, #tpu.memory_space<vmem>>, vector<32x784xf32>
    %cst_7 = arith.constant dense<0.000000e+00> : vector<32x128xf32>
    %10 = tpu.matmul %9, %8, %cst_7 {dimension_numbers = #tpu.dot_dimension_numbers<[1], [0], [0], [1], [0, 0, 1, 1], [], []>} : vector<32x784xf32>, vector<784x128xf32>, vector<32x128xf32> -> vector<32x128xf32>
    %c0_8 = arith.constant 0 : index
    %c0_9 = arith.constant 0 : index
    %11 = vector.load %arg5[%c0_8, %c0_9] : memref<32x1xf32, #tpu.memory_space<vmem>>, vector<32x1xf32>
    %12 = vector.broadcast %11 : vector<32x1xf32> to vector<32x128xf32>
    %13 = arith.addf %10, %12 : vector<32x128xf32>
    %c0_10 = arith.constant 0 : index
    %c0_11 = arith.constant 0 : index
    %14 = vector.load %arg6[%c0_10, %c0_11] : memref<10x32xf32, #tpu.memory_space<vmem>>, vector<10x32xf32>
    %cst_12 = arith.constant dense<0.000000e+00> : vector<10x128xf32>
    %15 = tpu.matmul %14, %13, %cst_12 {dimension_numbers = #tpu.dot_dimension_numbers<[1], [0], [0], [1], [0, 0, 1, 1], [], []>} : vector<10x32xf32>, vector<32x128xf32>, vector<10x128xf32> -> vector<10x128xf32>
    %c0_13 = arith.constant 0 : index
    %c0_14 = arith.constant 0 : index
    %16 = vector.load %arg7[%c0_13, %c0_14] : memref<10x1xf32, #tpu.memory_space<vmem>>, vector<10x1xf32>
    %17 = vector.broadcast %16 : vector<10x1xf32> to vector<10x128xf32>
    %18 = arith.addf %15, %17 : vector<10x128xf32>
    %c0_15 = arith.constant 0 : index
    %c0_16 = arith.constant 0 : index
    %19 = vector.load %arg8[%c0_15, %c0_16] : memref<10x128xf32, #tpu.memory_space<vmem>>, vector<10x128xf32>
    tpu.vector_store %arg8[%c0_15, %c0_16], %18 {strides = array<i32>} : memref<10x128xf32, #tpu.memory_space<vmem>>, vector<10x128xf32>,
    %cst_17 = arith.constant dense<0xFF800000> : vector<128xf32>
    %20 = vector.multi_reduction <maximumf>, %18, %cst_17 [0] : vector<10x128xf32> to vector<128xf32>
    %21 = vector.shape_cast %20 : vector<128xf32> to vector<1x128xf32>
    %22 = vector.broadcast %21 : vector<1x128xf32> to vector<10x128xf32>
    %23 = arith.subf %18, %22 : vector<10x128xf32>
    %24 = math.exp %23 : vector<10x128xf32>
    %cst_18 = arith.constant dense<0.000000e+00> : vector<128xf32>
    %25 = vector.multi_reduction <add>, %24, %cst_18 [0] : vector<10x128xf32> to vector<128xf32>
    %26 = vector.shape_cast %25 : vector<128xf32> to vector<1x128xf32>
    %27 = math.log %26 : vector<1x128xf32>
    %28 = vector.broadcast %27 : vector<1x128xf32> to vector<10x128xf32>
    %29 = arith.subf %23, %28 : vector<10x128xf32>
    %c0_19 = arith.constant 0 : index
    %c0_20 = arith.constant 0 : index
    %30 = vector.load %arg9[%c0_19, %c0_20] : memref<10x128xf32, #tpu.memory_space<vmem>>, vector<10x128xf32>
    tpu.vector_store %arg9[%c0_19, %c0_20], %29 {strides = array<i32>} : memref<10x128xf32, #tpu.memory_space<vmem>>, vector<10x128xf32>,
    return
  }
  func.func @transform_0(%arg0: i32) -> (i32, i32) {
    %c0_i32 = arith.constant 0 : i32
    %c0_i32_0 = arith.constant 0 : i32
    return %c0_i32, %arg0 : i32, i32
  }
  func.func @transform_1(%arg0: i32) -> (i32, i32) {
    %c0_i32 = arith.constant 0 : i32
    %c0_i32_0 = arith.constant 0 : i32
    %c0_i32_1 = arith.constant 0 : i32
    return %c0_i32, %c0_i32_0 : i32, i32
  }
  func.func @transform_2(%arg0: i32) -> (i32, i32) {
    %c0_i32 = arith.constant 0 : i32
    %c0_i32_0 = arith.constant 0 : i32
    %c0_i32_1 = arith.constant 0 : i32
    return %c0_i32, %c0_i32_0 : i32, i32
  }
  func.func @transform_3(%arg0: i32) -> (i32, i32) {
    %c0_i32 = arith.constant 0 : i32
    %c0_i32_0 = arith.constant 0 : i32
    %c0_i32_1 = arith.constant 0 : i32
    return %c0_i32, %c0_i32_0 : i32, i32
  }
  func.func @transform_4(%arg0: i32) -> (i32, i32) {
    %c0_i32 = arith.constant 0 : i32
    %c0_i32_0 = arith.constant 0 : i32
    %c0_i32_1 = arith.constant 0 : i32
    return %c0_i32, %c0_i32_0 : i32, i32
  }
  func.func @transform_5(%arg0: i32) -> (i32, i32) {
    %c0_i32 = arith.constant 0 : i32
    %c0_i32_0 = arith.constant 0 : i32
    %c0_i32_1 = arith.constant 0 : i32
    return %c0_i32, %c0_i32_0 : i32, i32
  }
  func.func @transform_6(%arg0: i32) -> (i32, i32) {
    %c0_i32 = arith.constant 0 : i32
    %c0_i32_0 = arith.constant 0 : i32
    %c0_i32_1 = arith.constant 0 : i32
    return %c0_i32, %c0_i32_0 : i32, i32
  }
  func.func @transform_7(%arg0: i32) -> (i32, i32) {
    %c0_i32 = arith.constant 0 : i32
    %c0_i32_0 = arith.constant 0 : i32
    return %c0_i32, %arg0 : i32, i32
  }
  func.func @transform_8(%arg0: i32) -> (i32, i32) {
    %c0_i32 = arith.constant 0 : i32
    %c0_i32_0 = arith.constant 0 : i32
    return %c0_i32, %arg0 : i32, i32
  }
}

</mosaic_0001>

<bundles_post_ra>
// kernel: net_forward.3
= control target key start
LH: loop header
LB: loop body
LE: loop exit
PB: predicated region body
PF: predicated region fallthrough
CT: control target
= control target key end

     0   :  { %vm51_vm0 = vcmask 1040384   ;;  %vm27_vm1 = vcmask 5120   ;;  %vm300_vm2 = vmmov 1   ;;  %v301_v3 = vmov 0.0   ;;  %s434_s0 = inlined_call_operand.vmem [shape: f32[9,512], index: 0, kind: input, shape index: {}]   ;;  %s435_s6 = inlined_call_operand.vmem [shape: f32[6,1], index: 6, kind: output, shape index: {1}]   ;;  %s436_s7 = inlined_call_operand.vmem [shape: f32[6,1], index: 7, kind: output, shape index: {2}]   ;;  %s437_s2 = inlined_call_operand.vmem [shape: f32[6,1], index: 2, kind: input, shape index: {}]   ;;  %s438_s1 = inlined_call_operand.vmem [shape: f32[6,9], index: 1, kind: input, shape index: {}]   ;;  %s439_s5 = inlined_call_operand.vmem [shape: f32[6,512], index: 5, kind: output, shape index: {0}]   ;;  %s440_s3 = inlined_call_operand.vmem [shape: f32[6,1], index: 3, kind: input, shape index: {}]   ;;  %s441_s4 = inlined_call_operand.vmem [shape: f32[6,1], index: 4, kind: input, shape index: {}]  }
   0x1   :  { %v34_v0 = vld [vmem:[%s434_s0 + $0x8] sm:$0xff]  ;;  %vm349_vm3 = vmpackc.low %vm51_vm0, %vm300_vm2  ;;  %30 = vst.msk [vmem:[%s435_s6] sm:$0x3f] %vm27_vm1, %v301_v3  ;;  %128 = vmatprep.mubr.f32.mxu0 %v301_v3  ;;  %199 = vmatprep.mubr.f32.mxu1 %v301_v3  ;;  %v36_v5 = vld [vmem:[%s434_s0 + $0x18] sm:$0xff]  ;;  %v302_v8 = vmov 0   ;;  %vm47_vm4 = vcmask 72704  }
   0x2   :  { %v38_v1 = vld [vmem:[%s434_s0 + $0x28] sm:$0x1]  ;;  %31 = vst.msk [vmem:[%s436_s7] sm:$0x3f] %vm27_vm1, %v301_v3  ;;  %28 = vst.msk [vmem:[#allocation2] sm:$0x3f] %vm27_vm1, %v301_v3  ;;  %297 = vset.pattern.permute.xlu0 %v302_v8 }
   0x3   :  { %29 = vst.msk [vmem:[#allocation3] sm:$0x3f] %vm27_vm1, %v301_v3  ;;  %v282_v4 = vpack.c.bf16 %v38_v1, %v34_v0  ;;  %v40_v6 = vld [vmem:[%s434_s0 + $0x38] sm:$0x1]  ;;  %v33_v7 = vld [vmem:[%s434_s0] sm:$0xff]  ;;  %v35_v11 = vld [vmem:[%s434_s0 + $0x10] sm:$0xff] }
   0x4   :  { %v288_v9 = vpack.c.bf16 %v40_v6, %v36_v5  ;;  %v37_v10 = vld [vmem:[%s434_s0 + $0x20] sm:$0x1]  ;;  %v39_v12 = vld [vmem:[%s434_s0 + $0x30] sm:$0x1]  ;;  %vm211_vm5 = vcmask 1045504  }
   0x5   :  { %284 = vmatprep.subr.msk.bf16.mxu0 %vm349_vm3, %v282_v4  ;;  %v285_v13 = vpack.c.bf16 %v37_v10, %v33_v7  ;;  %v291_v14 = vpack.c.bf16 %v39_v12, %v35_v11  ;;  %v41_v15 = vld [vmem:[%s437_s2] sm:$0x3f] }
   0x6   :  { %290 = vmatprep.subr.msk.bf16.mxu1 %vm349_vm3, %v288_v9  ;;  %44 = vperm.xlu0 %297, %v41_v15   ;;  %v32_v16 = vld [vmem:[%s438_s1] sm:$0x3f] }
   0x7   :  { %287 = vmatpush1.bf16.msk.msra.mxu0 %vm349_vm3, %v285_v13  ;;  %293 = vmatpush1.bf16.msk.msra.mxu1 %vm349_vm3, %v291_v14  ;;  %v243_v48 = vld [vmem:[%s437_s2] sm:$0x3f] }
   0x8   :  { %v248_v51 = vmul.f32 %v243_v48, %v243_v48  ;;  %v245_v52 = vmul.f32 120.0, %v243_v48  ;;  %v255_v63 = vld [vmem:[%s440_s3] sm:$0x3f] }
   0x9   :  { %v210_v44 = vld [vmem:[#allocation2] sm:$0x3f] }
   0xa   :  { %278 = vmatmul.mubr.msk.f32.vlgmr.msra.gmra.mrb[0].mxu0 %vm47_vm4, %v32_v16  ;;  %281 = vmatmul.mubr.msk.f32.vlgmr.msra.gmra.mrb[0].mxu1 %vm47_vm4, %v32_v16  ;;  %v224_v46 = vld [vmem:[#allocation3] sm:$0x3f]  ;;  %v249_v53 = vmul.f32 120.0, %v248_v51  ;;  %v260_v2 = vld [vmem:[%s441_s4] sm:$0x3f] }
  0x85   :  { %v45_v17 = vpop.permute.xlu0 %44 }
  0xdd   :  { %v130_v18 = vpop.f32.mrb[0].mxu0  ;;  %v201_v19 = vpop.f32.mrb[0].mxu1 }
  0xde   :  { %v131_v20 = vadd.f32 %v130_v18, %v45_v17  ;;  %v202_v21 = vadd.f32 %v201_v19, %v45_v17  ;;  %v132_v22 = vpop.f32.mrb[1].mxu0  ;;  %v203_v23 = vpop.f32.mrb[1].mxu1 }
  0xdf   :  { %v133_v24 = vadd.f32 %v132_v22, %v45_v17  ;;  %v204_v25 = vadd.f32 %v203_v23, %v45_v17 }
  0xe0   :  { %206 = vst [vmem:[%s439_s5] sm:$0x3f] %v131_v20  ;;  %v212_v26 = vsel %vm211_vm5, %v131_v20, 0.0  ;;  %v225_v27 = vmul.f32 %v131_v20, %v131_v20  ;;  %208 = vst [vmem:[%s439_s5 + $0x10] sm:$0x3f] %v202_v21  ;;  %v227_v30 = vmul.f32 %v202_v21, %v202_v21  ;;  %v215_v33 = vsel %vm211_vm5, %v202_v21, 0.0 }
  0xe1   :  { %207 = vst [vmem:[%s439_s5 + $0x8] sm:$0x3f] %v133_v24  ;;  %v213_v28 = vsel %vm211_vm5, %v133_v24, 0.0  ;;  %v226_v29 = vmul.f32 %v133_v24, %v133_v24  ;;  %209 = vst [vmem:[%s439_s5 + $0x18] sm:$0x3f] %v204_v25  ;;  %v228_v34 = vmul.f32 %v204_v25, %v204_v25  ;;  %v217_v38 = vsel %vm211_vm5, %v204_v25, 0.0 }
  0xe2   :  { %v214_v31 = vadd.f32 %v213_v28, %v212_v26  ;;  %v229_v32 = vsel %vm211_vm5, %v225_v27, 0.0  ;;  %v232_v39 = vsel %vm211_vm5, %v227_v30, 0.0 }
  0xe3   :  { %v230_v35 = vsel %vm211_vm5, %v226_v29, 0.0  ;;  %v234_v42 = vsel %vm211_vm5, %v228_v34, 0.0 }
  0xe4   :  { %v216_v36 = vadd.f32 %v215_v33, %v214_v31  ;;  %v231_v37 = vadd.f32 %v230_v35, %v229_v32 }
  0xe6   :  { %v218_v40 = vadd.f32 %v217_v38, %v216_v36  ;;  %v233_v41 = vadd.f32 %v232_v39, %v231_v37 }
  0xe8   :  { %219 = vadd.xlane.f32.xlu0 %v218_v40  ;;  %v235_v43 = vadd.f32 %v234_v42, %v233_v41 }
  0xea   :  { %236 = vadd.xlane.f32.xlu1 %v235_v43 }
 0x175   :  { %v220_v45 = vpop.xlane.xlu0 %219 }
 0x176   :  { %v221_v47 = vadd.f32 %v220_v45, %v210_v44 }
 0x177   :  { %v237_v49 = vpop.xlane.xlu1 %236 }
 0x178   :  { %223 = vst.msk [vmem:[#allocation2] sm:$0x3f] %vm27_vm1, %v221_v47  ;;  %v238_v50 = vadd.f32 %v237_v49, %v224_v46 }
 0x17a   :  { %239 = vst.msk [vmem:[#allocation3] sm:$0x3f] %vm27_vm1, %v238_v50 }
 0x17f   :  { %v244_v54 = vld [vmem:[#allocation2] sm:$0x3f] }
 0x180   :  { %v246_v55 = vsub.f32 %v244_v54, %v245_v52 }
 0x181   :  { %v247_v56 = vld [vmem:[#allocation3] sm:$0x3f] }
 0x182   :  { %v251_v57 = vmul.f32 0.0025510204, %v246_v55  ;;  %v250_v58 = vsub.f32 %v247_v56, %v249_v53 }
 0x184   :  { %v253_v59 = vmul.f32 %v251_v57, %v251_v57  ;;  %v252_v60 = vmul.f32 0.0025510204, %v250_v58 }
 0x186   :  { %v254_v61 = vsub.f32 %v252_v60, %v253_v59 }
 0x188   :  { %v256_v62 = vadd.f32 1e-05, %v254_v61 }
 0x18a   :  { %298 = vrsqrt.f32 %v256_v62 }
 0x194   :  { %v299_v0 = vpop.eup %298 }
 0x195   :  { %v258_v1 = vmul.f32 %v299_v0, %v255_v63 }
 0x197   :  { %259 = vst.msk [vmem:[%s435_s6] sm:$0x3f] %vm27_vm1, %v258_v1  ;;  %v261_v3 = vmul.f32 %v258_v1, %v251_v57 }
 0x199   :  { %v262_v4 = vsub.f32 %v260_v2, %v261_v3 }
 0x19b   :  { %263 = vst.msk [vmem:[%s436_s7] sm:$0x3f] %vm27_vm1, %v262_v4 }

// kernel: net_forward.4
= control target key start
LH: loop header
LB: loop body
LE: loop exit
PB: predicated region body
PF: predicated region fallthrough
CT: control target
= control target key end

     0   :  { %vm57_vm0 = vcmask 441344   ;;  %v273_v3 = vmov 0   ;;  %vm64_vm1 = vcmask 1045504   ;;  %vm27_vm2 = vcmask 7168   ;;  %s408_s0 = inlined_call_operand.vmem [shape: f32[54,128], index: 0, kind: input, shape index: {}]   ;;  %s409_s1 = inlined_call_operand.vmem [shape: f32[16,54], index: 1, kind: input, shape index: {}]   ;;  %s410_s2 = inlined_call_operand.vmem [shape: f32[16,1], index: 2, kind: input, shape index: {}]   ;;  %s411_s6 = inlined_call_operand.vmem [shape: f32[16,1], index: 6, kind: output, shape index: {1}]   ;;  %s412_s7 = inlined_call_operand.vmem [shape: f32[16,1], index: 7, kind: output, shape index: {2}]   ;;  %s413_s5 = inlined_call_operand.vmem [shape: f32[16,128], index: 5, kind: output, shape index: {0}]   ;;  %s414_s3 = inlined_call_operand.vmem [shape: f32[16,1], index: 3, kind: input, shape index: {}]   ;;  %s415_s4 = inlined_call_operand.vmem [shape: f32[16,1], index: 4, kind: input, shape index: {}]  }
   0x1   :  { %v38_v0 = vld [vmem:[%s408_s0] sm:$0xff]  ;;  %v39_v1 = vld [vmem:[%s408_s0 + $0x8] sm:$0xff]  ;;  %v40_v2 = vld [vmem:[%s408_s0 + $0x10] sm:$0xff]  ;;  %268 = vset.pattern.permute.xlu0 %v273_v3  ;;  %v274_v15 = vmov 0.0  }
   0x2   :  { %v254_v4 = vpack.c.bf16 %v39_v1, %v38_v0  ;;  %v41_v5 = vld [vmem:[%s408_s0 + $0x18] sm:$0xff]  ;;  %v42_v7 = vld [vmem:[%s408_s0 + $0x20] sm:$0xff]  ;;  %v43_v8 = vld [vmem:[%s408_s0 + $0x28] sm:$0xff]  ;;  %29 = vst.msk [vmem:[#allocation2 + $0x8] sm:$0xff] %vm27_vm2, %v274_v15 }
   0x3   :  { %v258_v6 = vpack.c.bf16 %v41_v5, %v40_v2  ;;  %v36_v9 = vld [vmem:[%s409_s1] sm:$0xff]  ;;  %v262_v11 = vpack.c.bf16 %v43_v8, %v42_v7  ;;  %v172_v12 = vld [vmem:[%s410_s2 + $0x8] sm:$0xff]  ;;  %v44_v13 = vld [vmem:[%s408_s0 + $0x30] sm:$0x3f]  ;;  %32 = vst.msk [vmem:[%s411_s6] sm:$0xff] %vm27_vm2, %v274_v15 }
   0x4   :  { %255 = vmatprep.subr.bf16.mxu0 %v254_v4  ;;  %251 = vmatprep.mubr.msk.f32.mxu0 %vm57_vm0, %v36_v9  ;;  %v45_v10 = vld [vmem:[%s410_s2] sm:$0xff]  ;;  %v37_v14 = vld [vmem:[%s409_s1 + $0x8] sm:$0xff]  ;;  %33 = vst.msk [vmem:[%s411_s6 + $0x8] sm:$0xff] %vm27_vm2, %v274_v15  ;;  %34 = vst.msk [vmem:[%s412_s7] sm:$0xff] %vm27_vm2, %v274_v15  ;;  %v176_v36 = vmul.f32 30.0, %v172_v12  ;;  %v182_v40 = vmul.f32 %v172_v12, %v172_v12 }
   0x5   :  { %257 = vmatpush3.bf16.msra.mxu0 %v254_v4  ;;  %49 = vperm.xlu0 %268, %v45_v10   ;;  %35 = vst.msk [vmem:[%s412_s7 + $0x8] sm:$0xff] %vm27_vm2, %v274_v15  ;;  %28 = vst.msk [vmem:[#allocation2] sm:$0xff] %vm27_vm2, %v274_v15  ;;  %v181_v34 = vmul.f32 %v45_v10, %v45_v10  ;;  %v175_v39 = vmul.f32 30.0, %v45_v10  ;;  %v195_v60 = vld [vmem:[%s414_s3] sm:$0xff]  ;;  %v196_v62 = vld [vmem:[%s414_s3 + $0x8] sm:$0xff] }
   0x6   :  { %259 = vmatprep.subr.bf16.mxu0 %v258_v6  ;;  %30 = vst.msk [vmem:[#allocation3] sm:$0xff] %vm27_vm2, %v274_v15  ;;  %31 = vst.msk [vmem:[#allocation3 + $0x8] sm:$0xff] %vm27_vm2, %v274_v15  ;;  %v184_v45 = vmul.f32 30.0, %v182_v40  ;;  %v205_v1 = vld [vmem:[%s415_s4] sm:$0xff]  ;;  %v206_v4 = vld [vmem:[%s415_s4 + $0x8] sm:$0xff] }
   0x7   :  { %v183_v41 = vmul.f32 30.0, %v181_v34 }
   0x9   :  { %261 = vmatpush3.bf16.msra.mxu0 %v258_v6  ;;  %54 = vperm.xlu0 %268, %v172_v12   ;;  %v146_v24 = vld [vmem:[#allocation2 + $0x8] sm:$0xff] }
   0xa   :  { %263 = vmatprep.subr.bf16.mxu0 %v262_v11 }
   0xc   :  { %v145_v28 = vld [vmem:[#allocation2] sm:$0xff] }
   0xd   :  { %265 = vmatpush3.bf16.msra.mxu0 %v262_v11  ;;  %v156_v27 = vld [vmem:[#allocation3] sm:$0xff]  ;;  %v157_v33 = vld [vmem:[#allocation3 + $0x8] sm:$0xff] }
   0xe   :  { %249 = vmatprep.subr.msk.mxu0 %vm64_vm1, %v44_v13 }
  0x11   :  { %250 = vmatpush3.msk.msra.mxu0 %vm64_vm1, %v44_v13 }
  0x12   :  { %252 = vmatmul.mubr.msk.f32.vlgmr.msra.gmra.mrb[0].mxu0 %vm57_vm0, %v37_v14 }
  0x84   :  { %v50_v16 = vpop.permute.xlu0 %49 }
  0x88   :  { %v55_v17 = vpop.permute.xlu0 %54 }
  0xe5   :  { %v253_v18 = vpop.f32.mrb[0].mxu0 }
  0xe6   :  { %v140_v19 = vadd.f32 %v253_v18, %v55_v17  ;;  %v134_v20 = vpop.f32.mrb[1].mxu0 }
  0xe7   :  { %v135_v21 = vadd.f32 %v134_v20, %v50_v16 }
  0xe8   :  { %144 = vst [vmem:[%s413_s5 + $0x8] sm:$0xff] %v140_v19  ;;  %149 = vadd.xlane.f32.xlu1 %v140_v19  ;;  %v159_v23 = vmul.f32 %v140_v19, %v140_v19 }
  0xe9   :  { %143 = vst [vmem:[%s413_s5] sm:$0xff] %v135_v21  ;;  %v158_v22 = vmul.f32 %v135_v21, %v135_v21 }
  0xeb   :  { %160 = vadd.xlane.f32.xlu0 %v158_v22 }
  0xec   :  { %147 = vadd.xlane.f32.xlu1 %v135_v21 }
  0xf0   :  { %162 = vadd.xlane.f32.xlu1 %v159_v23 }
 0x175   :  { %v150_v25 = vpop.xlane.xlu1 %149 }
 0x176   :  { %v152_v26 = vadd.f32 %v150_v25, %v146_v24 }
 0x178   :  { %155 = vst.msk [vmem:[#allocation2 + $0x8] sm:$0xff] %vm27_vm2, %v152_v26  ;;  %v161_v29 = vpop.xlane.xlu0 %160 }
 0x179   :  { %v164_v30 = vadd.f32 %v161_v29, %v156_v27  ;;  %v148_v31 = vpop.xlane.xlu1 %147 }
 0x17a   :  { %v151_v32 = vadd.f32 %v148_v31, %v145_v28 }
 0x17b   :  { %166 = vst.msk [vmem:[#allocation3] sm:$0xff] %vm27_vm2, %v164_v30 }
 0x17c   :  { %154 = vst.msk [vmem:[#allocation2] sm:$0xff] %vm27_vm2, %v151_v32 }
 0x17d   :  { %v163_v35 = vpop.xlane.xlu1 %162 }
 0x17e   :  { %v165_v37 = vadd.f32 %v163_v35, %v157_v33 }
 0x17f   :  { %v174_v38 = vld [vmem:[#allocation2 + $0x8] sm:$0xff] }
 0x180   :  { %167 = vst.msk [vmem:[#allocation3 + $0x8] sm:$0xff] %vm27_vm2, %v165_v37  ;;  %v178_v42 = vsub.f32 %v174_v38, %v176_v36 }
 0x182   :  { %v179_v43 = vld [vmem:[#allocation3] sm:$0xff]  ;;  %v188_v48 = vmul.f32 0.010204081, %v178_v42 }
 0x183   :  { %v173_v44 = vld [vmem:[#allocation2] sm:$0xff]  ;;  %v185_v46 = vsub.f32 %v179_v43, %v183_v41 }
 0x184   :  { %v177_v47 = vsub.f32 %v173_v44, %v175_v39  ;;  %v192_v54 = vmul.f32 %v188_v48, %v188_v48 }
 0x185   :  { %v189_v51 = vmul.f32 0.010204081, %v185_v46 }
 0x186   :  { %v187_v49 = vmul.f32 0.010204081, %v177_v47 }
 0x187   :  { %v180_v50 = vld [vmem:[#allocation3 + $0x8] sm:$0xff] }
 0x188   :  { %v191_v52 = vmul.f32 %v187_v49, %v187_v49  ;;  %v186_v53 = vsub.f32 %v180_v50, %v184_v45 }
 0x18a   :  { %v193_v55 = vsub.f32 %v189_v51, %v191_v52  ;;  %v190_v56 = vmul.f32 0.010204081, %v186_v53 }
 0x18c   :  { %v197_v57 = vadd.f32 1e-05, %v193_v55  ;;  %v194_v58 = vsub.f32 %v190_v56, %v192_v54 }
 0x18e   :  { %269 = vrsqrt.f32 %v197_v57  ;;  %v198_v59 = vadd.f32 1e-05, %v194_v58 }
 0x190   :  { %271 = vrsqrt.f32 %v198_v59 }
 0x198   :  { %v270_v61 = vpop.eup %269 }
 0x199   :  { %v201_v63 = vmul.f32 %v270_v61, %v195_v60 }
 0x19a   :  { %v272_v0 = vpop.eup %271 }
 0x19b   :  { %203 = vst.msk [vmem:[%s411_s6] sm:$0xff] %vm27_vm2, %v201_v63  ;;  %v207_v2 = vmul.f32 %v201_v63, %v187_v49  ;;  %v202_v3 = vmul.f32 %v272_v0, %v196_v62 }
 0x19d   :  { %v209_v5 = vsub.f32 %v205_v1, %v207_v2  ;;  %204 = vst.msk [vmem:[%s411_s6 + $0x8] sm:$0xff] %vm27_vm2, %v202_v3  ;;  %v208_v6 = vmul.f32 %v202_v3, %v188_v48 }
 0x19f   :  { %211 = vst.msk [vmem:[%s412_s7] sm:$0xff] %vm27_vm2, %v209_v5  ;;  %v210_v7 = vsub.f32 %v206_v4, %v208_v6 }
 0x1a1   :  { %212 = vst.msk [vmem:[%s412_s7 + $0x8] sm:$0xff] %vm27_vm2, %v210_v7 }

// kernel: net_forward.5
= control target key start
LH: loop header
LB: loop body
LE: loop exit
PB: predicated region body
PF: predicated region fallthrough
CT: control target
= control target key end

     0   :  { %v2424_v0 = vmov 0   ;;  %vm1648_vm0 = vcmask 130048   ;;  %vm2015_vm1 = vcmask 261120   ;;  %vm2099_vm2 = vcmask 1041408   ;;  %s3609_s1 = inlined_call_operand.vmem [shape: f32[784,1], index: 1, kind: input, shape index: {}]   ;;  %s3610_s2 = inlined_call_operand.vmem [shape: f32[784,1], index: 2, kind: input, shape index: {}]   ;;  %s3611_s3 = inlined_call_operand.vmem [shape: f32[32,784], index: 3, kind: input, shape index: {}]   ;;  %s3612_s0 = inlined_call_operand.vmem [shape: f32[784,128], index: 0, kind: input, shape index: {}]   ;;  %s3613_s4 = inlined_call_operand.vmem [shape: f32[32,1], index: 4, kind: input, shape index: {}]   ;;  %s3614_s6 = inlined_call_operand.vmem [shape: f32[10,1], index: 6, kind: input, shape index: {}]   ;;  %s3615_s5 = inlined_call_operand.vmem [shape: f32[10,32], index: 5, kind: input, shape index: {}]   ;;  %s3616_s7 = inlined_call_operand.vmem [shape: f32[10,128], index: 7, kind: output, shape index: {0}]   ;;  %s3617_s8 = inlined_call_operand.vmem [shape: f32[10,128], index: 8, kind: output, shape index: {1}]  }
   0x1   :  { %2417 = vset.pattern.permute.xlu1 %v2424_v0  ;;  %2416 = vset.pattern.permute.xlu0 %v2424_v0  ;;  %v128_v1 = vld [vmem:[%s3609_s1 + $0x10] sm:$0xff]  ;;  %v126_v2 = vld [vmem:[%s3609_s1] sm:$0xff]  ;;  %v129_v3 = vld [vmem:[%s3609_s1 + $0x18] sm:$0xff] }
   0x2   :  { %236 = vperm.xlu1 %2417, %v128_v1   ;;  %226 = vperm.xlu0 %2416, %v126_v2   ;;  %v127_v4 = vld [vmem:[%s3609_s1 + $0x8] sm:$0xff]  ;;  %v130_v6 = vld [vmem:[%s3609_s1 + $0x20] sm:$0xff]  ;;  %v133_v7 = vld [vmem:[%s3609_s1 + $0x38] sm:$0xff] }
   0x3   :  { %v131_v5 = vld [vmem:[%s3609_s1 + $0x28] sm:$0xff]  ;;  %v132_v8 = vld [vmem:[%s3609_s1 + $0x30] sm:$0xff]  ;;  %v134_v10 = vld [vmem:[%s3609_s1 + $0x40] sm:$0xff] }
   0x4   :  { %v135_v9 = vld [vmem:[%s3609_s1 + $0x48] sm:$0xff]  ;;  %v137_v11 = vld [vmem:[%s3609_s1 + $0x58] sm:$0xff]  ;;  %v136_v12 = vld [vmem:[%s3609_s1 + $0x50] sm:$0xff] }
   0x5   :  { %v139_v13 = vld [vmem:[%s3609_s1 + $0x68] sm:$0xff]  ;;  %v138_v14 = vld [vmem:[%s3609_s1 + $0x60] sm:$0xff]  ;;  %v141_v15 = vld [vmem:[%s3609_s1 + $0x78] sm:$0xff] }
   0x6   :  { %241 = vperm.xlu1 %2417, %v129_v3   ;;  %231 = vperm.xlu0 %2416, %v127_v4   ;;  %v140_v16 = vld [vmem:[%s3609_s1 + $0x70] sm:$0xff]  ;;  %v143_v17 = vld [vmem:[%s3609_s1 + $0x88] sm:$0xff]  ;;  %v142_v18 = vld [vmem:[%s3609_s1 + $0x80] sm:$0xff] }
   0x7   :  { %v145_v19 = vld [vmem:[%s3609_s1 + $0x98] sm:$0xff]  ;;  %v144_v20 = vld [vmem:[%s3609_s1 + $0x90] sm:$0xff]  ;;  %v147_v21 = vld [vmem:[%s3609_s1 + $0xa8] sm:$0xff] }
   0x8   :  { %v146_v22 = vld [vmem:[%s3609_s1 + $0xa0] sm:$0xff]  ;;  %v149_v23 = vld [vmem:[%s3609_s1 + $0xb8] sm:$0xff]  ;;  %v148_v24 = vld [vmem:[%s3609_s1 + $0xb0] sm:$0xff] }
   0x9   :  { %v151_v25 = vld [vmem:[%s3609_s1 + $0xc8] sm:$0xff]  ;;  %v150_v26 = vld [vmem:[%s3609_s1 + $0xc0] sm:$0xff]  ;;  %v153_v27 = vld [vmem:[%s3609_s1 + $0xd8] sm:$0xff] }
   0xa   :  { %251 = vperm.xlu1 %2417, %v131_v5   ;;  %246 = vperm.xlu0 %2416, %v130_v6   ;;  %v152_v28 = vld [vmem:[%s3609_s1 + $0xd0] sm:$0xff]  ;;  %v155_v29 = vld [vmem:[%s3609_s1 + $0xe8] sm:$0xff]  ;;  %v154_v30 = vld [vmem:[%s3609_s1 + $0xe0] sm:$0xff] }
   0xb   :  { %v157_v31 = vld [vmem:[%s3609_s1 + $0xf8] sm:$0xff]  ;;  %v156_v32 = vld [vmem:[%s3609_s1 + $0xf0] sm:$0xff]  ;;  %v159_v33 = vld [vmem:[%s3609_s1 + $0x108] sm:$0xff] }
   0xc   :  { %v158_v34 = vld [vmem:[%s3609_s1 + $0x100] sm:$0xff]  ;;  %v161_v35 = vld [vmem:[%s3609_s1 + $0x118] sm:$0xff]  ;;  %v160_v36 = vld [vmem:[%s3609_s1 + $0x110] sm:$0xff] }
   0xd   :  { %v163_v37 = vld [vmem:[%s3609_s1 + $0x128] sm:$0xff]  ;;  %v162_v38 = vld [vmem:[%s3609_s1 + $0x120] sm:$0xff]  ;;  %v165_v39 = vld [vmem:[%s3609_s1 + $0x138] sm:$0xff] }
   0xe   :  { %261 = vperm.xlu1 %2417, %v133_v7   ;;  %256 = vperm.xlu0 %2416, %v132_v8   ;;  %v164_v40 = vld [vmem:[%s3609_s1 + $0x130] sm:$0xff]  ;;  %v828_v41 = vld [vmem:[%s3610_s2 + $0x80] sm:$0xff]  ;;  %v829_v44 = vld [vmem:[%s3610_s2 + $0x88] sm:$0xff] }
   0xf   :  { %v166_v42 = vld [vmem:[%s3609_s1 + $0x140] sm:$0xff]  ;;  %v830_v45 = vld [vmem:[%s3610_s2 + $0x90] sm:$0xff]  ;;  %v813_v46 = vld [vmem:[%s3610_s2 + $0x8] sm:$0xff] }
  0x10   :  { %v812_v43 = vld [vmem:[%s3610_s2] sm:$0xff]  ;;  %v814_v47 = vld [vmem:[%s3610_s2 + $0x10] sm:$0xff]  ;;  %v831_v48 = vld [vmem:[%s3610_s2 + $0x98] sm:$0xff] }
  0x11   :  { %v832_v49 = vld [vmem:[%s3610_s2 + $0xa0] sm:$0xff]  ;;  %v815_v50 = vld [vmem:[%s3610_s2 + $0x18] sm:$0xff]  ;;  %v833_v52 = vld [vmem:[%s3610_s2 + $0xa8] sm:$0xff] }
  0x12   :  { %271 = vperm.xlu1 %2417, %v135_v9   ;;  %266 = vperm.xlu0 %2416, %v134_v10   ;;  %v816_v51 = vld [vmem:[%s3610_s2 + $0x20] sm:$0xff]  ;;  %v834_v53 = vld [vmem:[%s3610_s2 + $0xb0] sm:$0xff]  ;;  %v817_v54 = vld [vmem:[%s3610_s2 + $0x28] sm:$0xff] }
  0x13   :  { %v818_v55 = vld [vmem:[%s3610_s2 + $0x30] sm:$0xff]  ;;  %v835_v56 = vld [vmem:[%s3610_s2 + $0xb8] sm:$0xff]  ;;  %v836_v57 = vld [vmem:[%s3610_s2 + $0xc0] sm:$0xff] }
  0x14   :  { %v819_v58 = vld [vmem:[%s3610_s2 + $0x38] sm:$0xff]  ;;  %v820_v59 = vld [vmem:[%s3610_s2 + $0x40] sm:$0xff]  ;;  %v837_v60 = vld [vmem:[%s3610_s2 + $0xc8] sm:$0xff] }
  0x15   :  { %v838_v61 = vld [vmem:[%s3610_s2 + $0xd0] sm:$0xff]  ;;  %v821_v62 = vld [vmem:[%s3610_s2 + $0x48] sm:$0xff]  ;;  %v839_v0 = vld [vmem:[%s3610_s2 + $0xd8] sm:$0xff] }
  0x16   :  { %281 = vperm.xlu1 %2417, %v137_v11   ;;  %276 = vperm.xlu0 %2416, %v136_v12   ;;  %v822_v63 = vld [vmem:[%s3610_s2 + $0x50] sm:$0xff]  ;;  %v840_v1 = vld [vmem:[%s3610_s2 + $0xe0] sm:$0xff]  ;;  %v823_v2 = vld [vmem:[%s3610_s2 + $0x58] sm:$0xff] }
  0x17   :  { %v824_v5 = vld [vmem:[%s3610_s2 + $0x60] sm:$0xff]  ;;  %v841_v6 = vld [vmem:[%s3610_s2 + $0xe8] sm:$0xff] }
  0x18   :  { %v174_v9 = vld [vmem:[%s3609_s1 + $0x180] sm:$0xff]  ;;  %v825_v10 = vld [vmem:[%s3610_s2 + $0x68] sm:$0xff] }
  0x1a   :  { %291 = vperm.xlu1 %2417, %v139_v13   ;;  %286 = vperm.xlu0 %2416, %v138_v14   ;;  %v842_v13 = vld [vmem:[%s3610_s2 + $0xf0] sm:$0xff]  ;;  %v175_v14 = vld [vmem:[%s3609_s1 + $0x188] sm:$0xff] }
  0x1e   :  { %301 = vperm.xlu1 %2417, %v141_v15   ;;  %296 = vperm.xlu0 %2416, %v140_v16  }
  0x22   :  { %311 = vperm.xlu1 %2417, %v143_v17   ;;  %306 = vperm.xlu0 %2416, %v142_v18   ;;  %v860_v17 = vld [vmem:[%s3610_s2 + $0x180] sm:$0xff]  ;;  %v843_v18 = vld [vmem:[%s3610_s2 + $0xf8] sm:$0xff] }
  0x26   :  { %321 = vperm.xlu1 %2417, %v145_v19   ;;  %316 = vperm.xlu0 %2416, %v144_v20  }
  0x2a   :  { %331 = vperm.xlu1 %2417, %v147_v21   ;;  %326 = vperm.xlu0 %2416, %v146_v22   ;;  %v826_v21 = vld [vmem:[%s3610_s2 + $0x70] sm:$0xff]  ;;  %v861_v22 = vld [vmem:[%s3610_s2 + $0x188] sm:$0xff] }
  0x2e   :  { %341 = vperm.xlu1 %2417, %v149_v23   ;;  %336 = vperm.xlu0 %2416, %v148_v24  }
  0x32   :  { %351 = vperm.xlu1 %2417, %v151_v25   ;;  %346 = vperm.xlu0 %2416, %v150_v26   ;;  %v844_v25 = vld [vmem:[%s3610_s2 + $0x100] sm:$0xff]  ;;  %v827_v26 = vld [vmem:[%s3610_s2 + $0x78] sm:$0xff] }
  0x36   :  { %361 = vperm.xlu1 %2417, %v153_v27   ;;  %356 = vperm.xlu0 %2416, %v152_v28  }
  0x3a   :  { %371 = vperm.xlu1 %2417, %v155_v29   ;;  %366 = vperm.xlu0 %2416, %v154_v30   ;;  %v176_v29 = vld [vmem:[%s3609_s1 + $0x190] sm:$0xff]  ;;  %v845_v30 = vld [vmem:[%s3610_s2 + $0x108] sm:$0xff] }
  0x3e   :  { %381 = vperm.xlu1 %2417, %v157_v31   ;;  %376 = vperm.xlu0 %2416, %v156_v32  }
  0x42   :  { %391 = vperm.xlu1 %2417, %v159_v33   ;;  %386 = vperm.xlu0 %2416, %v158_v34   ;;  %v206_v33 = vld [vmem:[%s3609_s1 + $0x280] sm:$0xff]  ;;  %v177_v34 = vld [vmem:[%s3609_s1 + $0x198] sm:$0xff] }
  0x46   :  { %401 = vperm.xlu1 %2417, %v161_v35   ;;  %396 = vperm.xlu0 %2416, %v160_v36  }
  0x4a   :  { %411 = vperm.xlu1 %2417, %v163_v37   ;;  %406 = vperm.xlu0 %2416, %v162_v38   ;;  %v190_v37 = vld [vmem:[%s3609_s1 + $0x200] sm:$0xff]  ;;  %v207_v38 = vld [vmem:[%s3609_s1 + $0x288] sm:$0xff] }
  0x4e   :  { %421 = vperm.xlu1 %2417, %v165_v39   ;;  %416 = vperm.xlu0 %2416, %v164_v40  }
  0x52   :  { %992 = vperm.xlu1 %2417, %v828_v41   ;;  %426 = vperm.xlu0 %2416, %v166_v42   ;;  %v862_v41 = vld [vmem:[%s3610_s2 + $0x190] sm:$0xff]  ;;  %v191_v42 = vld [vmem:[%s3609_s1 + $0x208] sm:$0xff] }
  0x56   :  { %912 = vperm.xlu1 %2417, %v812_v43   ;;  %997 = vperm.xlu0 %2416, %v829_v44  }
  0x5a   :  { %1002 = vperm.xlu1 %2417, %v830_v45   ;;  %917 = vperm.xlu0 %2416, %v813_v46   ;;  %v1597_v45 = vld [vmem:[%s3611_s3 + $0x8] sm:$0xff]  ;;  %v892_v46 = vld [vmem:[%s3610_s2 + $0x280] sm:$0xff] }
  0x5b   :  { %1725 = vmatprep.mubr.f32.mxu0 %v1597_v45 }
  0x5e   :  { %922 = vperm.xlu1 %2417, %v814_v47   ;;  %1007 = vperm.xlu0 %2416, %v831_v48   ;;  %v863_v47 = vld [vmem:[%s3610_s2 + $0x198] sm:$0xff] }
  0x62   :  { %1012 = vperm.xlu1 %2417, %v832_v49   ;;  %927 = vperm.xlu0 %2416, %v815_v50   ;;  %v846_v50 = vld [vmem:[%s3610_s2 + $0x110] sm:$0xff] }
  0x66   :  { %932 = vperm.xlu1 %2417, %v816_v51   ;;  %1017 = vperm.xlu0 %2416, %v833_v52   ;;  %v893_v51 = vld [vmem:[%s3610_s2 + $0x288] sm:$0xff] }
  0x6a   :  { %1022 = vperm.xlu1 %2417, %v834_v53   ;;  %937 = vperm.xlu0 %2416, %v817_v54   ;;  %v876_v54 = vld [vmem:[%s3610_s2 + $0x200] sm:$0xff] }
  0x6e   :  { %942 = vperm.xlu1 %2417, %v818_v55   ;;  %1027 = vperm.xlu0 %2416, %v835_v56   ;;  %v847_v55 = vld [vmem:[%s3610_s2 + $0x118] sm:$0xff] }
  0x72   :  { %1032 = vperm.xlu1 %2417, %v836_v57   ;;  %947 = vperm.xlu0 %2416, %v819_v58   ;;  %v178_v58 = vld [vmem:[%s3609_s1 + $0x1a0] sm:$0xff] }
  0x76   :  { %952 = vperm.xlu1 %2417, %v820_v59   ;;  %1037 = vperm.xlu0 %2416, %v837_v60   ;;  %v877_v59 = vld [vmem:[%s3610_s2 + $0x208] sm:$0xff] }
  0x7a   :  { %1042 = vperm.xlu1 %2417, %v838_v61   ;;  %957 = vperm.xlu0 %2416, %v821_v62   ;;  %v208_v62 = vld [vmem:[%s3609_s1 + $0x290] sm:$0xff] }
  0x7e   :  { %962 = vperm.xlu1 %2417, %v822_v63   ;;  %1047 = vperm.xlu0 %2416, %v839_v0   ;;  %v179_v63 = vld [vmem:[%s3609_s1 + $0x1a8] sm:$0xff] }
  0x81   :  { %v2668_v3 = vpop.permute.xlu1 %236  ;;  %v2670_v4 = vpop.permute.xlu0 %226 }
  0x82   :  { %1052 = vperm.xlu1 %2417, %v840_v1   ;;  %967 = vperm.xlu0 %2416, %v823_v2   ;;  %v192_v2 = vld [vmem:[%s3609_s1 + $0x210] sm:$0xff] }
  0x85   :  { %v2678_v7 = vpop.permute.xlu1 %241  ;;  %v2680_v8 = vpop.permute.xlu0 %231 }
  0x86   :  { %972 = vperm.xlu1 %2417, %v824_v5   ;;  %1057 = vperm.xlu0 %2416, %v841_v6   ;;  %v209_v5 = vld [vmem:[%s3609_s1 + $0x298] sm:$0xff] }
  0x89   :  { %v2688_v11 = vpop.permute.xlu1 %251  ;;  %v2690_v12 = vpop.permute.xlu0 %246 }
  0x8a   :  { %466 = vperm.xlu1 %2417, %v174_v9   ;;  %977 = vperm.xlu0 %2416, %v825_v10   ;;  %v864_v10 = vld [vmem:[%s3610_s2 + $0x1a0] sm:$0xff] }
  0x8d   :  { %v2698_v15 = vpop.permute.xlu1 %261  ;;  %v2700_v16 = vpop.permute.xlu0 %256 }
  0x8e   :  { %1062 = vperm.xlu1 %2417, %v842_v13   ;;  %471 = vperm.xlu0 %2416, %v175_v14   ;;  %v193_v13 = vld [vmem:[%s3609_s1 + $0x218] sm:$0xff] }
  0x91   :  { %v2708_v19 = vpop.permute.xlu1 %271  ;;  %v2710_v20 = vpop.permute.xlu0 %266 }
  0x92   :  { %1152 = vperm.xlu1 %2417, %v860_v17   ;;  %1067 = vperm.xlu0 %2416, %v843_v18   ;;  %v894_v18 = vld [vmem:[%s3610_s2 + $0x290] sm:$0xff] }
  0x95   :  { %v2718_v23 = vpop.permute.xlu1 %281  ;;  %v2720_v24 = vpop.permute.xlu0 %276 }
  0x96   :  { %982 = vperm.xlu1 %2417, %v826_v21   ;;  %1157 = vperm.xlu0 %2416, %v861_v22   ;;  %v865_v21 = vld [vmem:[%s3610_s2 + $0x1a8] sm:$0xff] }
  0x99   :  { %v2728_v27 = vpop.permute.xlu1 %291  ;;  %v2730_v28 = vpop.permute.xlu0 %286 }
  0x9a   :  { %1072 = vperm.xlu1 %2417, %v844_v25   ;;  %987 = vperm.xlu0 %2416, %v827_v26   ;;  %v848_v26 = vld [vmem:[%s3610_s2 + $0x120] sm:$0xff] }
  0x9d   :  { %v2738_v31 = vpop.permute.xlu1 %301  ;;  %v2740_v32 = vpop.permute.xlu0 %296 }
  0x9e   :  { %476 = vperm.xlu1 %2417, %v176_v29   ;;  %1077 = vperm.xlu0 %2416, %v845_v30   ;;  %v895_v29 = vld [vmem:[%s3610_s2 + $0x298] sm:$0xff] }
  0xa1   :  { %v2748_v35 = vpop.permute.xlu1 %311  ;;  %v2750_v36 = vpop.permute.xlu0 %306 }
  0xa2   :  { %626 = vperm.xlu1 %2417, %v206_v33   ;;  %481 = vperm.xlu0 %2416, %v177_v34   ;;  %v44_v34 = vld [vmem:[%s3612_s0 + $0x80] sm:$0xff] }
  0xa5   :  { %v2758_v39 = vpop.permute.xlu1 %321  ;;  %v2760_v40 = vpop.permute.xlu0 %316 }
  0xa6   :  { %546 = vperm.xlu1 %2417, %v190_v37   ;;  %631 = vperm.xlu0 %2416, %v207_v38   ;;  %v878_v37 = vld [vmem:[%s3610_s2 + $0x210] sm:$0xff]  ;;  %v849_v38 = vld [vmem:[%s3610_s2 + $0x128] sm:$0xff] }
  0xa9   :  { %v2768_v43 = vpop.permute.xlu1 %331  ;;  %v2770_v44 = vpop.permute.xlu0 %326 }
  0xaa   :  { %1162 = vperm.xlu1 %2417, %v862_v41   ;;  %551 = vperm.xlu0 %2416, %v191_v42   ;;  %v45_v41 = vld [vmem:[%s3612_s0 + $0x88] sm:$0xff] }
  0xad   :  { %v2781_v48 = vpop.permute.xlu1 %341  ;;  %v2783_v49 = vpop.permute.xlu0 %336 }
  0xae   :  { %1312 = vperm.xlu1 %2417, %v892_v46   ;;  %1167 = vperm.xlu0 %2416, %v863_v47   ;;  %v730_v46 = vmul.f32 %v2750_v36, %v44_v34  ;;  %v28_v47 = vld [vmem:[%s3612_s0] sm:$0xff]  ;;  %v29_v36 = vld [vmem:[%s3612_s0 + $0x8] sm:$0xff] }
  0xb1   :  { %v2791_v52 = vpop.permute.xlu1 %351  ;;  %v2793_v53 = vpop.permute.xlu0 %346 }
  0xb2   :  { %1082 = vperm.xlu1 %2417, %v846_v50   ;;  %1317 = vperm.xlu0 %2416, %v893_v51   ;;  %v180_v50 = vld [vmem:[%s3609_s1 + $0x1b0] sm:$0xff]  ;;  %v879_v51 = vld [vmem:[%s3610_s2 + $0x218] sm:$0xff] }
  0xb5   :  { %v2801_v56 = vpop.permute.xlu1 %361  ;;  %v2803_v57 = vpop.permute.xlu0 %356 }
  0xb6   :  { %1232 = vperm.xlu1 %2417, %v876_v54   ;;  %1087 = vperm.xlu0 %2416, %v847_v55   ;;  %v731_v54 = vmul.f32 %v2748_v35, %v45_v41  ;;  %v210_v35 = vld [vmem:[%s3609_s1 + $0x2a0] sm:$0xff]  ;;  %v30_v41 = vld [vmem:[%s3612_s0 + $0x10] sm:$0xff] }
  0xb9   :  { %v2811_v60 = vpop.permute.xlu1 %371  ;;  %v2813_v61 = vpop.permute.xlu0 %366 }
  0xba   :  { %486 = vperm.xlu1 %2417, %v178_v58   ;;  %1237 = vperm.xlu0 %2416, %v877_v59  }
  0xbd   :  { %v2821_v0 = vpop.permute.xlu1 %381  ;;  %v2823_v1 = vpop.permute.xlu0 %376 }
  0xbe   :  { %636 = vperm.xlu1 %2417, %v208_v62   ;;  %491 = vperm.xlu0 %2416, %v179_v63   ;;  %v714_v62 = vmul.f32 %v2670_v4, %v28_v47 }
  0xc1   :  { %v2831_v6 = vpop.permute.xlu1 %391  ;;  %v2833_v9 = vpop.permute.xlu0 %386 }
  0xc2   :  { %556 = vperm.xlu1 %2417, %v192_v2   ;;  %641 = vperm.xlu0 %2416, %v209_v5   ;;  %v46_v2 = vld [vmem:[%s3612_s0 + $0x90] sm:$0xff]  ;;  %v181_v5 = vld [vmem:[%s3609_s1 + $0x1b8] sm:$0xff] }
  0xc3   :  { %v732_v34 = vmul.f32 %v2760_v40, %v46_v2 }
  0xc5   :  { %v2841_v14 = vpop.permute.xlu1 %401  ;;  %v2843_v17 = vpop.permute.xlu0 %396 }
  0xc6   :  { %1172 = vperm.xlu1 %2417, %v864_v10   ;;  %561 = vperm.xlu0 %2416, %v193_v13   ;;  %v715_v10 = vmul.f32 %v2680_v8, %v29_v36  ;;  %v194_v8 = vld [vmem:[%s3609_s1 + $0x220] sm:$0xff]  ;;  %v716_v36 = vmul.f32 %v2668_v3, %v30_v41 }
  0xc9   :  { %v2851_v22 = vpop.permute.xlu1 %411  ;;  %v2853_v25 = vpop.permute.xlu0 %406 }
  0xca   :  { %1322 = vperm.xlu1 %2417, %v894_v18   ;;  %1177 = vperm.xlu0 %2416, %v865_v21   ;;  %v47_v21 = vld [vmem:[%s3612_s0 + $0x98] sm:$0xff] }
  0xcd   :  { %v2861_v30 = vpop.permute.xlu1 %421  ;;  %v2863_v33 = vpop.permute.xlu0 %416 }
  0xce   :  { %1092 = vperm.xlu1 %2417, %v848_v26   ;;  %1327 = vperm.xlu0 %2416, %v895_v29  }
  0xd1   :  { %v993_v42 = vpop.permute.xlu1 %992  ;;  %v2877_v45 = vpop.permute.xlu0 %426 }
  0xd2   :  { %1242 = vperm.xlu1 %2417, %v878_v37   ;;  %1097 = vperm.xlu0 %2416, %v849_v38   ;;  %v1416_v55 = vadd.f32 %v993_v42, %v730_v46  ;;  %v211_v42 = vld [vmem:[%s3609_s1 + $0x2a8] sm:$0xff]  ;;  %v733_v46 = vmul.f32 %v2758_v39, %v47_v21  ;;  %v48_v39 = vld [vmem:[%s3612_s0 + $0xa0] sm:$0xff] }
  0xd4   :  { %v1514_v18 = vmax.f32 %v1416_v55, 0.0 }
  0xd5   :  { %v913_v58 = vpop.permute.xlu1 %912  ;;  %v998_v59 = vpop.permute.xlu0 %997 }
  0xd6   :  { %v1417_v63 = vadd.f32 %v998_v59, %v731_v54  ;;  %496 = vperm.xlu1 %2417, %v180_v50   ;;  %1247 = vperm.xlu0 %2416, %v879_v51   ;;  %v1400_v13 = vadd.f32 %v913_v58, %v714_v62  ;;  %v31_v51 = vld [vmem:[%s3612_s0 + $0x18] sm:$0xff]  ;;  %v866_v62 = vld [vmem:[%s3610_s2 + $0x1b0] sm:$0xff] }
  0xd7   :  { %v717_v2 = vmul.f32 %v2678_v7, %v31_v51  ;;  %v32_v7 = vld [vmem:[%s3612_s0 + $0x20] sm:$0xff]  ;;  %v850_v51 = vld [vmem:[%s3610_s2 + $0x130] sm:$0xff] }
  0xd8   :  { %v1515_v4 = vmax.f32 %v1417_v63, 0.0  ;;  %v1498_v47 = vmax.f32 %v1400_v13, 0.0  ;;  %v195_v63 = vld [vmem:[%s3609_s1 + $0x228] sm:$0xff] }
  0xd9   :  { %v1003_v26 = vpop.permute.xlu1 %1002  ;;  %v918_v29 = vpop.permute.xlu0 %917 }
  0xda   :  { %v1401_v37 = vadd.f32 %v918_v29, %v715_v10  ;;  %646 = vperm.xlu1 %2417, %v210_v35   ;;  %501 = vperm.xlu0 %2416, %v181_v5   ;;  %v2307_v38 = vpack.c.bf16 %v1515_v4, %v1514_v18  ;;  %v1418_v40 = vadd.f32 %v1003_v26, %v732_v34  ;;  %v49_v10 = vld [vmem:[%s3612_s0 + $0xa8] sm:$0xff]  ;;  %v896_v29 = vld [vmem:[%s3610_s2 + $0x2a0] sm:$0xff]  ;;  %v867_v34 = vld [vmem:[%s3610_s2 + $0x1b8] sm:$0xff] }
  0xdb   :  { %v734_v4 = vmul.f32 %v2770_v44, %v48_v39 }
  0xdc   :  { %v1499_v50 = vmax.f32 %v1401_v37, 0.0  ;;  %2308 = vmatprep.subr.bf16.mxu0 %v2307_v38  ;;  %v1516_v35 = vmax.f32 %v1418_v40, 0.0  ;;  %v735_v37 = vmul.f32 %v2768_v43, %v49_v10  ;;  %v50_v43 = vld [vmem:[%s3612_s0 + $0xb0] sm:$0xff] }
  0xdd   :  { %v923_v54 = vpop.permute.xlu1 %922  ;;  %v1008_v55 = vpop.permute.xlu0 %1007 }
  0xde   :  { %v1419_v58 = vadd.f32 %v1008_v55, %v733_v46  ;;  %566 = vperm.xlu1 %2417, %v194_v8   ;;  %651 = vperm.xlu0 %2416, %v211_v42   ;;  %v2309_v59 = vpack.c.bf16 %v1499_v50, %v1498_v47  ;;  %v1402_v3 = vadd.f32 %v923_v54, %v716_v36  ;;  %v33_v8 = vld [vmem:[%s3612_s0 + $0x28] sm:$0xff] }
  0xdf   :  { %v718_v47 = vmul.f32 %v2690_v12, %v32_v7  ;;  %v897_v54 = vld [vmem:[%s3610_s2 + $0x2a8] sm:$0xff]  ;;  %v719_v55 = vmul.f32 %v2688_v11, %v33_v8  ;;  %v34_v11 = vld [vmem:[%s3612_s0 + $0x30] sm:$0xff] }
  0xe0   :  { %v1517_v5 = vmax.f32 %v1419_v58, 0.0  ;;  %2310 = vmatpush3.bf16.msra.mxu0 %v2309_v59  ;;  %v1500_v38 = vmax.f32 %v1402_v3, 0.0  ;;  %v51_v59 = vld [vmem:[%s3612_s0 + $0xb8] sm:$0xff]  ;;  %v880_v3 = vld [vmem:[%s3610_s2 + $0x220] sm:$0xff]  ;;  %v720_v7 = vmul.f32 %v2700_v16, %v34_v11 }
  0xe1   :  { %v1013_v13 = vpop.permute.xlu1 %1012  ;;  %v928_v18 = vpop.permute.xlu0 %927  ;;  %v737_v10 = vmul.f32 %v2781_v48, %v51_v59  ;;  %v52_v48 = vld [vmem:[%s3612_s0 + $0xc0] sm:$0xff]  ;;  %v213_v11 = vld [vmem:[%s3609_s1 + $0x2b8] sm:$0xff] }
  0xe2   :  { %v1403_v21 = vadd.f32 %v928_v18, %v717_v2  ;;  %1182 = vperm.xlu1 %2417, %v866_v62   ;;  %571 = vperm.xlu0 %2416, %v195_v63   ;;  %v2311_v26 = vpack.c.bf16 %v1517_v5, %v1516_v35  ;;  %v1420_v44 = vadd.f32 %v1013_v13, %v734_v4  ;;  %v851_v5 = vld [vmem:[%s3610_s2 + $0x138] sm:$0xff] }
  0xe3   :  { %v736_v63 = vmul.f32 %v2783_v49, %v50_v43  ;;  %v35_v4 = vld [vmem:[%s3612_s0 + $0x38] sm:$0xff] }
  0xe4   :  { %v1501_v41 = vmax.f32 %v1403_v21, 0.0  ;;  %2312 = vmatprep.subr.bf16.mxu0 %v2311_v26  ;;  %v1518_v36 = vmax.f32 %v1420_v44, 0.0  ;;  %v721_v44 = vmul.f32 %v2698_v15, %v35_v4  ;;  %v36_v15 = vld [vmem:[%s3612_s0 + $0x40] sm:$0xff] }
  0xe5   :  { %v933_v42 = vpop.permute.xlu1 %932  ;;  %v1018_v46 = vpop.permute.xlu0 %1017 }
  0xe6   :  { %v1421_v40 = vadd.f32 %v1018_v46, %v735_v37  ;;  %1332 = vperm.xlu1 %2417, %v896_v29   ;;  %1187 = vperm.xlu0 %2416, %v867_v34   ;;  %v2313_v50 = vpack.c.bf16 %v1501_v41, %v1500_v38  ;;  %v1404_v12 = vadd.f32 %v933_v42, %v718_v47  ;;  %v182_v37 = vld [vmem:[%s3609_s1 + $0x1c0] sm:$0xff]  ;;  %v881_v38 = vld [vmem:[%s3610_s2 + $0x228] sm:$0xff] }
  0xe7   :  { %v53_v42 = vld [vmem:[%s3612_s0 + $0xc8] sm:$0xff] }
  0xe8   :  { %v1519_v58 = vmax.f32 %v1421_v40, 0.0  ;;  %2314 = vmatpush3.bf16.msra.mxu0 %v2313_v50  ;;  %v1502_v13 = vmax.f32 %v1404_v12, 0.0  ;;  %v738_v40 = vmul.f32 %v2793_v53, %v52_v48 }
  0xe9   :  { %v1023_v39 = vpop.permute.xlu1 %1022  ;;  %v938_v62 = vpop.permute.xlu0 %937 }
  0xea   :  { %v1405_v2 = vadd.f32 %v938_v62, %v719_v55  ;;  %1102 = vperm.xlu1 %2417, %v850_v51   ;;  %1337 = vperm.xlu0 %2416, %v897_v54   ;;  %v2315_v35 = vpack.c.bf16 %v1519_v58, %v1518_v36  ;;  %v1422_v49 = vadd.f32 %v1023_v39, %v736_v63  ;;  %v212_v51 = vld [vmem:[%s3609_s1 + $0x2b0] sm:$0xff]  ;;  %v183_v54 = vld [vmem:[%s3609_s1 + $0x1c8] sm:$0xff] }
  0xeb   :  { %v739_v55 = vmul.f32 %v2791_v52, %v53_v42  ;;  %v37_v58 = vld [vmem:[%s3612_s0 + $0x48] sm:$0xff]  ;;  %v722_v62 = vmul.f32 %v2710_v20, %v36_v15  ;;  %v54_v52 = vld [vmem:[%s3612_s0 + $0xd0] sm:$0xff] }
  0xec   :  { %v1503_v18 = vmax.f32 %v1405_v2, 0.0  ;;  %2316 = vmatprep.subr.bf16.mxu0 %v2315_v35  ;;  %v1520_v41 = vmax.f32 %v1422_v49, 0.0  ;;  %v167_v35 = vld [vmem:[%s3609_s1 + $0x148] sm:$0xff]  ;;  %v740_v4 = vmul.f32 %v2803_v57, %v54_v52 }
  0xed   :  { %v943_v21 = vpop.permute.xlu1 %942  ;;  %v1028_v26 = vpop.permute.xlu0 %1027  ;;  %v57_v15 = vld [vmem:[%s3612_s0 + $0xe8] sm:$0xff] }
  0xee   :  { %v1423_v29 = vadd.f32 %v1028_v26, %v737_v10  ;;  %1252 = vperm.xlu1 %2417, %v880_v3   ;;  %1107 = vperm.xlu0 %2416, %v851_v5   ;;  %v2317_v34 = vpack.c.bf16 %v1503_v18, %v1502_v13  ;;  %v1406_v16 = vadd.f32 %v943_v21, %v720_v7  ;;  %v55_v13 = vld [vmem:[%s3612_s0 + $0xd8] sm:$0xff] }
  0xef   :  { %v723_v3 = vmul.f32 %v2708_v19, %v37_v58  ;;  %v38_v19 = vld [vmem:[%s3612_s0 + $0x50] sm:$0xff]  ;;  %v197_v7 = vld [vmem:[%s3609_s1 + $0x238] sm:$0xff] }
  0xf0   :  { %v1521_v8 = vmax.f32 %v1423_v29, 0.0  ;;  %2318 = vmatpush3.bf16.msra.mxu0 %v2317_v34  ;;  %v1504_v36 = vmax.f32 %v1406_v16, 0.0  ;;  %v196_v29 = vld [vmem:[%s3609_s1 + $0x230] sm:$0xff]  ;;  %v741_v34 = vmul.f32 %v2801_v56, %v55_v13  ;;  %v724_v16 = vmul.f32 %v2720_v24, %v38_v19  ;;  %v56_v56 = vld [vmem:[%s3612_s0 + $0xe0] sm:$0xff]  ;;  %v883_v19 = vld [vmem:[%s3610_s2 + $0x238] sm:$0xff] }
  0xf1   :  { %v1033_v46 = vpop.permute.xlu1 %1032  ;;  %v948_v47 = vpop.permute.xlu0 %947  ;;  %v898_v58 = vld [vmem:[%s3610_s2 + $0x2b0] sm:$0xff] }
  0xf2   :  { %v1407_v50 = vadd.f32 %v948_v47, %v721_v44  ;;  %506 = vperm.xlu1 %2417, %v182_v37   ;;  %1257 = vperm.xlu0 %2416, %v881_v38   ;;  %v2319_v43 = vpack.c.bf16 %v1521_v8, %v1520_v41  ;;  %v1424_v53 = vadd.f32 %v1033_v46, %v738_v40  ;;  %v39_v38 = vld [vmem:[%s3612_s0 + $0x58] sm:$0xff]  ;;  %v869_v46 = vld [vmem:[%s3610_s2 + $0x1c8] sm:$0xff]  ;;  %v868_v47 = vld [vmem:[%s3610_s2 + $0x1c0] sm:$0xff] }
  0xf3   :  { %v725_v40 = vmul.f32 %v2718_v23, %v39_v38  ;;  %v40_v23 = vld [vmem:[%s3612_s0 + $0x60] sm:$0xff] }
  0xf4   :  { %v1505_v12 = vmax.f32 %v1407_v50, 0.0  ;;  %2320 = vmatprep.subr.bf16.mxu0 %v2319_v43  ;;  %v1522_v5 = vmax.f32 %v1424_v53, 0.0 }
  0xf5   :  { %v953_v59 = vpop.permute.xlu1 %952  ;;  %v1038_v39 = vpop.permute.xlu0 %1037 }
  0xf6   :  { %v1425_v63 = vadd.f32 %v1038_v39, %v739_v55  ;;  %656 = vperm.xlu1 %2417, %v212_v51   ;;  %511 = vperm.xlu0 %2416, %v183_v54   ;;  %v2321_v2 = vpack.c.bf16 %v1505_v12, %v1504_v36  ;;  %v1408_v20 = vadd.f32 %v953_v59, %v722_v62  ;;  %v899_v12 = vld [vmem:[%s3610_s2 + $0x2b8] sm:$0xff] }
  0xf7   :  { %v742_v55 = vmul.f32 %v2813_v61, %v56_v56  ;;  %v743_v59 = vmul.f32 %v2811_v60, %v57_v15  ;;  %v853_v60 = vld [vmem:[%s3610_s2 + $0x148] sm:$0xff] }
  0xf8   :  { %v1523_v10 = vmax.f32 %v1425_v63, 0.0  ;;  %2322 = vmatpush3.bf16.msra.mxu0 %v2321_v2  ;;  %v1506_v48 = vmax.f32 %v1408_v20, 0.0  ;;  %v41_v63 = vld [vmem:[%s3612_s0 + $0x68] sm:$0xff] }
  0xf9   :  { %v1043_v49 = vpop.permute.xlu1 %1042  ;;  %v958_v18 = vpop.permute.xlu0 %957  ;;  %v727_v20 = vmul.f32 %v2728_v27, %v41_v63  ;;  %v882_v27 = vld [vmem:[%s3610_s2 + $0x230] sm:$0xff] }
  0xfa   :  { %v1409_v21 = vadd.f32 %v958_v18, %v723_v3  ;;  %431 = vperm.xlu1 %2417, %v167_v35   ;;  %661 = vperm.xlu0 %2416, %v213_v11   ;;  %v2323_v26 = vpack.c.bf16 %v1523_v10, %v1522_v5  ;;  %v1426_v57 = vadd.f32 %v1043_v49, %v740_v4  ;;  %v852_v5 = vld [vmem:[%s3610_s2 + $0x140] sm:$0xff] }
  0xfb   :  { %v726_v35 = vmul.f32 %v2730_v28, %v40_v23 }
  0xfc   :  { %v1507_v37 = vmax.f32 %v1409_v21, 0.0  ;;  %2324 = vmatprep.subr.bf16.mxu0 %v2323_v26  ;;  %v1524_v50 = vmax.f32 %v1426_v57, 0.0  ;;  %v58_v26 = vld [vmem:[%s3612_s0 + $0xf0] sm:$0xff] }
  0xfd   :  { %v963_v44 = vpop.permute.xlu1 %962  ;;  %v1048_v41 = vpop.permute.xlu0 %1047 }
  0xfe   :  { %v1427_v8 = vadd.f32 %v1048_v41, %v741_v34  ;;  %581 = vperm.xlu1 %2417, %v197_v7   ;;  %576 = vperm.xlu0 %2416, %v196_v29   ;;  %v2325_v42 = vpack.c.bf16 %v1507_v37, %v1506_v48  ;;  %v1410_v24 = vadd.f32 %v963_v44, %v724_v16  ;;  %v59_v34 = vld [vmem:[%s3612_s0 + $0xf8] sm:$0xff]  ;;  %v76_v44 = vld [vmem:[%s3612_s0 + $0x180] sm:$0xff]  ;;  %v184_v16 = vld [vmem:[%s3609_s1 + $0x1d0] sm:$0xff] }
  0xff   :  { %v744_v37 = vmul.f32 %v2823_v1, %v58_v26  ;;  %v185_v41 = vld [vmem:[%s3609_s1 + $0x1d8] sm:$0xff]  ;;  %v77_v1 = vld [vmem:[%s3612_s0 + $0x188] sm:$0xff] }
 0x100   :  { %v1525_v43 = vmax.f32 %v1427_v8, 0.0  ;;  %2326 = vmatpush3.bf16.msra.mxu0 %v2325_v42  ;;  %v1508_v39 = vmax.f32 %v1410_v24, 0.0  ;;  %v745_v8 = vmul.f32 %v2821_v0, %v59_v34  ;;  %v215_v0 = vld [vmem:[%s3609_s1 + $0x2c8] sm:$0xff]  ;;  %v214_v24 = vld [vmem:[%s3609_s1 + $0x2c0] sm:$0xff]  ;;  %v871_v26 = vld [vmem:[%s3610_s2 + $0x1d8] sm:$0xff] }
 0x101   :  { %v1053_v51 = vpop.permute.xlu1 %1052  ;;  %v968_v54 = vpop.permute.xlu0 %967 }
 0x102   :  { %v1411_v36 = vadd.f32 %v968_v54, %v725_v40  ;;  %1197 = vperm.xlu1 %2417, %v869_v46   ;;  %1192 = vperm.xlu0 %2416, %v868_v47   ;;  %v2327_v53 = vpack.c.bf16 %v1525_v43, %v1524_v50  ;;  %v1428_v61 = vadd.f32 %v1053_v51, %v742_v55  ;;  %v42_v50 = vld [vmem:[%s3612_s0 + $0x70] sm:$0xff]  ;;  %v43_v55 = vld [vmem:[%s3612_s0 + $0x78] sm:$0xff] }
 0x103   :  { %v728_v23 = vmul.f32 %v2740_v32, %v42_v50 }
 0x104   :  { %v1509_v62 = vmax.f32 %v1411_v36, 0.0  ;;  %2328 = vmatprep.subr.bf16.mxu0 %v2327_v53  ;;  %v1526_v10 = vmax.f32 %v1428_v61, 0.0  ;;  %v168_v61 = vld [vmem:[%s3609_s1 + $0x150] sm:$0xff] }
 0x105   :  { %v973_v2 = vpop.permute.xlu1 %972  ;;  %v1058_v52 = vpop.permute.xlu0 %1057 }
 0x106   :  { %v1429_v11 = vadd.f32 %v1058_v52, %v743_v59  ;;  %1347 = vperm.xlu1 %2417, %v899_v12   ;;  %1342 = vperm.xlu0 %2416, %v898_v58   ;;  %v2329_v3 = vpack.c.bf16 %v1509_v62, %v1508_v39  ;;  %v1412_v13 = vadd.f32 %v973_v2, %v726_v35  ;;  %v60_v59 = vld [vmem:[%s3612_s0 + $0x100] sm:$0xff]  ;;  %v169_v39 = vld [vmem:[%s3609_s1 + $0x158] sm:$0xff]  ;;  %v61_v52 = vld [vmem:[%s3612_s0 + $0x108] sm:$0xff] }
 0x107   :  { %v729_v62 = vmul.f32 %v2738_v31, %v43_v55  ;;  %v199_v31 = vld [vmem:[%s3609_s1 + $0x248] sm:$0xff] }
 0x108   :  { %v1527_v49 = vmax.f32 %v1429_v11, 0.0  ;;  %2330 = vmatpush3.bf16.msra.mxu0 %v2329_v3  ;;  %v1510_v7 = vmax.f32 %v1412_v13, 0.0  ;;  %v746_v3 = vmul.f32 %v2833_v9, %v60_v59 }
 0x109   :  { %v467_v18 = vpop.permute.xlu1 %466  ;;  %v978_v28 = vpop.permute.xlu0 %977 }
 0x10a   :  { %v1413_v4 = vadd.f32 %v978_v28, %v727_v20  ;;  %1117 = vperm.xlu1 %2417, %v853_v60   ;;  %1112 = vperm.xlu0 %2416, %v852_v5   ;;  %v2331_v21 = vpack.c.bf16 %v1527_v49, %v1526_v10  ;;  %v762_v47 = vmul.f32 %v467_v18, %v76_v44  ;;  %v198_v20 = vld [vmem:[%s3609_s1 + $0x240] sm:$0xff]  ;;  %v1603_v44 = vld [vmem:[%s3611_s3 + $0x38] sm:$0xff] }
 0x10b   :  { %v747_v10 = vmul.f32 %v2831_v6, %v61_v52 }
 0x10c   :  { %v1511_v29 = vmax.f32 %v1413_v4, 0.0  ;;  %2332 = vmatprep.subr.bf16.mxu0 %v2331_v21 }
 0x10d   :  { %v1063_v48 = vpop.permute.xlu1 %1062  ;;  %v472_v57 = vpop.permute.xlu0 %471 }
 0x10e   :  { %1267 = vperm.xlu1 %2417, %v883_v19   ;;  %1262 = vperm.xlu0 %2416, %v882_v27   ;;  %v2333_v38 = vpack.c.bf16 %v1511_v29, %v1510_v7  ;;  %v1430_v42 = vadd.f32 %v1063_v48, %v744_v37  ;;  %v763_v15 = vmul.f32 %v472_v57, %v77_v1  ;;  %v870_v19 = vld [vmem:[%s3610_s2 + $0x1d0] sm:$0xff]  ;;  %v1596_v7 = vld [vmem:[%s3611_s3] sm:$0xff]  ;;  %v901_v37 = vld [vmem:[%s3610_s2 + $0x2c8] sm:$0xff] }
 0x10f   :  { %v1604_v48 = vld [vmem:[%s3611_s3 + $0x40] sm:$0xff]  ;;  %v855_v1 = vld [vmem:[%s3610_s2 + $0x158] sm:$0xff] }
 0x110   :  { %2334 = vmatpush3.bf16.msra.mxu0 %v2333_v38  ;;  %v1528_v43 = vmax.f32 %v1430_v42, 0.0  ;;  %v900_v38 = vld [vmem:[%s3610_s2 + $0x2c0] sm:$0xff]  ;;  %v78_v42 = vld [vmem:[%s3612_s0 + $0x190] sm:$0xff] }
 0x111   :  { %v1153_v56 = vpop.permute.xlu1 %1152  ;;  %v1068_v46 = vpop.permute.xlu0 %1067 }
 0x112   :  { %v1431_v40 = vadd.f32 %v1068_v46, %v745_v8  ;;  %521 = vperm.xlu1 %2417, %v185_v41   ;;  %516 = vperm.xlu0 %2416, %v184_v16   ;;  %v1448_v51 = vadd.f32 %v1153_v56, %v762_v47  ;;  %v1611_v8 = vld [vmem:[%s3611_s3 + $0x78] sm:$0xff]  ;;  %v854_v56 = vld [vmem:[%s3610_s2 + $0x150] sm:$0xff] }
 0x113   :  { %v1610_v46 = vld [vmem:[%s3611_s3 + $0x70] sm:$0xff]  ;;  %v79_v47 = vld [vmem:[%s3612_s0 + $0x198] sm:$0xff] }
 0x114   :  { %v1529_v54 = vmax.f32 %v1431_v40, 0.0  ;;  %v1546_v32 = vmax.f32 %v1448_v51, 0.0  ;;  %v884_v51 = vld [vmem:[%s3610_s2 + $0x240] sm:$0xff] }
 0x115   :  { %v983_v36 = vpop.permute.xlu1 %982  ;;  %v1158_v53 = vpop.permute.xlu0 %1157 }
 0x116   :  { %v1449_v12 = vadd.f32 %v1158_v53, %v763_v15  ;;  %671 = vperm.xlu1 %2417, %v215_v0   ;;  %666 = vperm.xlu0 %2416, %v214_v24   ;;  %v2335_v58 = vpack.c.bf16 %v1529_v54, %v1528_v43  ;;  %v1414_v63 = vadd.f32 %v983_v36, %v728_v23  ;;  %v1618_v0 = vld [vmem:[%s3611_s3 + $0xb0] sm:$0xff]  ;;  %v108_v43 = vld [vmem:[%s3612_s0 + $0x280] sm:$0xff]  ;;  %v885_v15 = vld [vmem:[%s3610_s2 + $0x248] sm:$0xff] }
 0x117   :  { %v1617_v36 = vld [vmem:[%s3611_s3 + $0xa8] sm:$0xff] }
 0x118   :  { %2336 = vmatprep.subr.bf16.mxu0 %v2335_v58  ;;  %v1547_v2 = vmax.f32 %v1449_v12, 0.0  ;;  %v1512_v13 = vmax.f32 %v1414_v63, 0.0  ;;  %v109_v53 = vld [vmem:[%s3612_s0 + $0x288] sm:$0xff] }
 0x119   :  { %v1073_v35 = vpop.permute.xlu1 %1072  ;;  %v988_v11 = vpop.permute.xlu0 %987 }
 0x11a   :  { %v1415_v60 = vadd.f32 %v988_v11, %v729_v62  ;;  %441 = vperm.xlu1 %2417, %v169_v39   ;;  %436 = vperm.xlu0 %2416, %v168_v61   ;;  %v2339_v5 = vpack.c.bf16 %v1547_v2, %v1546_v32  ;;  %v1432_v49 = vadd.f32 %v1073_v35, %v746_v3  ;;  %v62_v39 = vld [vmem:[%s3612_s0 + $0x110] sm:$0xff]  ;;  %v187_v61 = vld [vmem:[%s3609_s1 + $0x1e8] sm:$0xff]  ;;  %v186_v62 = vld [vmem:[%s3609_s1 + $0x1e0] sm:$0xff] }
 0x11b   :  { %v63_v35 = vld [vmem:[%s3612_s0 + $0x118] sm:$0xff] }
 0x11c   :  { %v1513_v18 = vmax.f32 %v1415_v60, 0.0  ;;  %2340 = vmatprep.subr.bf16.mxu1 %v2339_v5  ;;  %v1530_v27 = vmax.f32 %v1432_v49, 0.0  ;;  %v748_v60 = vmul.f32 %v2843_v17, %v62_v39  ;;  %v749_v49 = vmul.f32 %v2841_v14, %v63_v35  ;;  %v170_v14 = vld [vmem:[%s3609_s1 + $0x160] sm:$0xff]  ;;  %v111_v39 = vld [vmem:[%s3612_s0 + $0x298] sm:$0xff]  ;;  %v886_v35 = vld [vmem:[%s3610_s2 + $0x250] sm:$0xff] }
 0x11d   :  { %v477_v28 = vpop.permute.xlu1 %476  ;;  %v1078_v9 = vpop.permute.xlu0 %1077 }
 0x11e   :  { %v1433_v4 = vadd.f32 %v1078_v9, %v747_v10  ;;  %591 = vperm.xlu1 %2417, %v199_v31   ;;  %586 = vperm.xlu0 %2416, %v198_v20   ;;  %v2337_v21 = vpack.c.bf16 %v1513_v18, %v1512_v13  ;;  %v764_v24 = vmul.f32 %v477_v28, %v78_v42  ;;  %v92_v20 = vld [vmem:[%s3612_s0 + $0x200] sm:$0xff]  ;;  %v217_v10 = vld [vmem:[%s3609_s1 + $0x2d8] sm:$0xff]  ;;  %v216_v13 = vld [vmem:[%s3609_s1 + $0x2d0] sm:$0xff] }
 0x11f   :  { %v93_v9 = vld [vmem:[%s3612_s0 + $0x208] sm:$0xff] }
 0x120   :  { %v1531_v6 = vmax.f32 %v1433_v4, 0.0  ;;  %2338 = vmatpush3.bf16.msra.mxu0 %v2337_v21 }
 0x121   :  { %v627_v29 = vpop.permute.xlu1 %626  ;;  %v482_v34 = vpop.permute.xlu0 %481 }
 0x122   :  { %1207 = vperm.xlu1 %2417, %v871_v26   ;;  %1202 = vperm.xlu0 %2416, %v870_v19   ;;  %v2341_v57 = vpack.c.bf16 %v1531_v6, %v1530_v27  ;;  %v765_v54 = vmul.f32 %v482_v34, %v79_v47  ;;  %v794_v58 = vmul.f32 %v627_v29, %v108_v43  ;;  %v171_v6 = vld [vmem:[%s3609_s1 + $0x168] sm:$0xff]  ;;  %v903_v43 = vld [vmem:[%s3610_s2 + $0x2d8] sm:$0xff] }
 0x123   :  { %1726 = vmatmul.mubr.f32.vlgmr.msra.gmra.mrb[0].mxu0 %v1596_v7  ;;  %v873_v47 = vld [vmem:[%s3610_s2 + $0x1e8] sm:$0xff] }
 0x124   :  { %2342 = vmatpush3.bf16.msra.mxu1 %v2341_v57  ;;  %1730 = vmatprep.mubr.f32.mxu0 %v1604_v48 }
 0x125   :  { %v547_v41 = vpop.permute.xlu1 %546  ;;  %v632_v16 = vpop.permute.xlu0 %631 }
 0x126   :  { %1357 = vperm.xlu1 %2417, %v901_v37   ;;  %1352 = vperm.xlu0 %2416, %v900_v38   ;;  %v795_v63 = vmul.f32 %v632_v16, %v109_v53  ;;  %v778_v26 = vmul.f32 %v547_v41, %v92_v20  ;;  %v201_v41 = vld [vmem:[%s3609_s1 + $0x258] sm:$0xff]  ;;  %v200_v16 = vld [vmem:[%s3609_s1 + $0x250] sm:$0xff] }
 0x127   :  { %1731 = vmatmul.mubr.f32.gmra.mrb[2].mxu0 %v1603_v44  ;;  %v110_v53 = vld [vmem:[%s3612_s0 + $0x290] sm:$0xff] }
 0x128   :  { %1735 = vmatprep.mubr.f32.mxu0 %v1611_v8 }
 0x129   :  { %v1163_v40 = vpop.permute.xlu1 %1162  ;;  %v552_v50 = vpop.permute.xlu0 %551 }
 0x12a   :  { %1127 = vperm.xlu1 %2417, %v855_v1   ;;  %1122 = vperm.xlu0 %2416, %v854_v56   ;;  %v1450_v55 = vadd.f32 %v1163_v40, %v764_v24  ;;  %v779_v7 = vmul.f32 %v552_v50, %v93_v9  ;;  %v872_v40 = vld [vmem:[%s3610_s2 + $0x1e0] sm:$0xff]  ;;  %v188_v9 = vld [vmem:[%s3609_s1 + $0x1f0] sm:$0xff] }
 0x12b   :  { %1736 = vmatmul.mubr.f32.gmra.mrb[4].mxu0 %v1610_v46  ;;  %v80_v24 = vld [vmem:[%s3612_s0 + $0x1a0] sm:$0xff] }
 0x12c   :  { %1740 = vmatprep.mubr.f32.mxu0 %v1618_v0  ;;  %v1548_v32 = vmax.f32 %v1450_v55, 0.0 }
 0x12d   :  { %v1313_v23 = vpop.permute.xlu1 %1312  ;;  %v1168_v12 = vpop.permute.xlu0 %1167 }
 0x12e   :  { %v1451_v59 = vadd.f32 %v1168_v12, %v765_v54  ;;  %1277 = vperm.xlu1 %2417, %v885_v15   ;;  %1272 = vperm.xlu0 %2416, %v884_v51   ;;  %v1480_v2 = vadd.f32 %v1313_v23, %v794_v58  ;;  %v902_v15 = vld [vmem:[%s3610_s2 + $0x2d0] sm:$0xff]  ;;  %v81_v51 = vld [vmem:[%s3612_s0 + $0x1a8] sm:$0xff]  ;;  %v856_v12 = vld [vmem:[%s3610_s2 + $0x160] sm:$0xff] }
 0x12f   :  { %1741 = vmatmul.mubr.f32.gmra.mrb[6].mxu0 %v1617_v36  ;;  %v857_v23 = vld [vmem:[%s3610_s2 + $0x168] sm:$0xff] }
 0x130   :  { %v1549_v52 = vmax.f32 %v1451_v59, 0.0  ;;  %v1578_v18 = vmax.f32 %v1480_v2, 0.0  ;;  %v64_v2 = vld [vmem:[%s3612_s0 + $0x120] sm:$0xff] }
 0x131   :  { %v1083_v11 = vpop.permute.xlu1 %1082  ;;  %v1318_v3 = vpop.permute.xlu0 %1317 }
 0x132   :  { %v1481_v5 = vadd.f32 %v1318_v3, %v795_v63  ;;  %531 = vperm.xlu1 %2417, %v187_v61   ;;  %526 = vperm.xlu0 %2416, %v186_v62   ;;  %v2343_v31 = vpack.c.bf16 %v1549_v52, %v1548_v32  ;;  %v1434_v17 = vadd.f32 %v1083_v11, %v748_v60  ;;  %v887_v52 = vld [vmem:[%s3610_s2 + $0x258] sm:$0xff] }
 0x134   :  { %v1579_v28 = vmax.f32 %v1481_v5, 0.0  ;;  %2344 = vmatprep.subr.bf16.mxu1 %v2343_v31  ;;  %v1532_v29 = vmax.f32 %v1434_v17, 0.0  ;;  %v65_v31 = vld [vmem:[%s3612_s0 + $0x128] sm:$0xff]  ;;  %v94_v17 = vld [vmem:[%s3612_s0 + $0x210] sm:$0xff] }
 0x135   :  { %v1233_v4 = vpop.permute.xlu1 %1232  ;;  %v1088_v21 = vpop.permute.xlu0 %1087 }
 0x136   :  { %v1435_v19 = vadd.f32 %v1088_v21, %v749_v49  ;;  %681 = vperm.xlu1 %2417, %v217_v10   ;;  %676 = vperm.xlu0 %2416, %v216_v13   ;;  %v2371_v27 = vpack.c.bf16 %v1579_v28, %v1578_v18  ;;  %v1464_v34 = vadd.f32 %v1233_v4, %v778_v26  ;;  %v189_v28 = vld [vmem:[%s3609_s1 + $0x1f8] sm:$0xff] }
 0x137   :  { %v750_v13 = vmul.f32 %v2853_v25, %v64_v2  ;;  %v751_v4 = vmul.f32 %v2851_v22, %v65_v31  ;;  %v218_v22 = vld [vmem:[%s3609_s1 + $0x2e0] sm:$0xff] }
 0x138   :  { %v1533_v48 = vmax.f32 %v1435_v19, 0.0  ;;  %2372 = vmatprep.subr.bf16.mxu0 %v2371_v27  ;;  %v1562_v8 = vmax.f32 %v1464_v34, 0.0  ;;  %v95_v19 = vld [vmem:[%s3612_s0 + $0x218] sm:$0xff]  ;;  %v219_v34 = vld [vmem:[%s3609_s1 + $0x2e8] sm:$0xff] }
 0x139   :  { %v487_v57 = vpop.permute.xlu1 %486  ;;  %v1238_v37 = vpop.permute.xlu0 %1237 }
 0x13a   :  { %v1465_v38 = vadd.f32 %v1238_v37, %v779_v7  ;;  %451 = vperm.xlu1 %2417, %v171_v6   ;;  %446 = vperm.xlu0 %2416, %v170_v14   ;;  %v2345_v44 = vpack.c.bf16 %v1533_v48, %v1532_v29  ;;  %v766_v36 = vmul.f32 %v487_v57, %v80_v24  ;;  %v202_v24 = vld [vmem:[%s3609_s1 + $0x260] sm:$0xff] }
 0x13c   :  { %v1563_v42 = vmax.f32 %v1465_v38, 0.0  ;;  %2346 = vmatpush3.bf16.msra.mxu1 %v2345_v44 }
 0x13d   :  { %v637_v1 = vpop.permute.xlu1 %636  ;;  %v492_v56 = vpop.permute.xlu0 %491 }
 0x13e   :  { %v2373_v46 = vpack.c.bf16 %v1563_v42, %v1562_v8  ;;  %601 = vperm.xlu1 %2417, %v201_v41   ;;  %596 = vperm.xlu0 %2416, %v200_v16   ;;  %v767_v58 = vmul.f32 %v492_v56, %v81_v51  ;;  %v796_v63 = vmul.f32 %v637_v1, %v110_v53  ;;  %v173_v42 = vld [vmem:[%s3609_s1 + $0x178] sm:$0xff]  ;;  %v172_v1 = vld [vmem:[%s3609_s1 + $0x170] sm:$0xff] }
 0x13f   :  { %v82_v51 = vld [vmem:[%s3612_s0 + $0x1b0] sm:$0xff] }
 0x140   :  { %2374 = vmatpush3.bf16.msra.mxu0 %v2373_v46 }
 0x141   :  { %v557_v50 = vpop.permute.xlu1 %556  ;;  %v642_v0 = vpop.permute.xlu0 %641 }
 0x142   :  { %1217 = vperm.xlu1 %2417, %v873_v47   ;;  %1212 = vperm.xlu0 %2416, %v872_v40   ;;  %v797_v11 = vmul.f32 %v642_v0, %v111_v39  ;;  %v780_v14 = vmul.f32 %v557_v50, %v94_v17  ;;  %v203_v0 = vld [vmem:[%s3609_s1 + $0x268] sm:$0xff]  ;;  %v904_v39 = vld [vmem:[%s3610_s2 + $0x2e0] sm:$0xff] }
 0x145   :  { %v1173_v54 = vpop.permute.xlu1 %1172  ;;  %v562_v55 = vpop.permute.xlu0 %561 }
 0x146   :  { %1367 = vperm.xlu1 %2417, %v903_v43   ;;  %1362 = vperm.xlu0 %2416, %v902_v15   ;;  %v1452_v59 = vadd.f32 %v1173_v54, %v766_v36  ;;  %v781_v48 = vmul.f32 %v562_v55, %v95_v19  ;;  %v875_v54 = vld [vmem:[%s3610_s2 + $0x1f8] sm:$0xff]  ;;  %v874_v55 = vld [vmem:[%s3610_s2 + $0x1f0] sm:$0xff] }
 0x147   :  { %v83_v36 = vld [vmem:[%s3612_s0 + $0x1b8] sm:$0xff] }
 0x148   :  { %v1550_v3 = vmax.f32 %v1452_v59, 0.0  ;;  %v905_v59 = vld [vmem:[%s3610_s2 + $0x2e8] sm:$0xff] }
 0x149   :  { %v1323_v61 = vpop.permute.xlu1 %1322  ;;  %v1178_v62 = vpop.permute.xlu0 %1177 }
 0x14a   :  { %v1453_v32 = vadd.f32 %v1178_v62, %v767_v58  ;;  %1137 = vperm.xlu1 %2417, %v857_v23   ;;  %1132 = vperm.xlu0 %2416, %v856_v12   ;;  %v1482_v60 = vadd.f32 %v1323_v61, %v796_v63  ;;  %v112_v58 = vld [vmem:[%s3612_s0 + $0x2a0] sm:$0xff]  ;;  %v113_v63 = vld [vmem:[%s3612_s0 + $0x2a8] sm:$0xff] }
 0x14c   :  { %v1551_v5 = vmax.f32 %v1453_v32, 0.0  ;;  %v1580_v21 = vmax.f32 %v1482_v60, 0.0  ;;  %v858_v60 = vld [vmem:[%s3610_s2 + $0x170] sm:$0xff] }
 0x14d   :  { %v1093_v20 = vpop.permute.xlu1 %1092  ;;  %v1328_v10 = vpop.permute.xlu0 %1327 }
 0x14e   :  { %v1483_v49 = vadd.f32 %v1328_v10, %v797_v11  ;;  %1287 = vperm.xlu1 %2417, %v887_v52   ;;  %1282 = vperm.xlu0 %2416, %v886_v35   ;;  %v2347_v18 = vpack.c.bf16 %v1551_v5, %v1550_v3  ;;  %v1436_v25 = vadd.f32 %v1093_v20, %v750_v13  ;;  %v66_v11 = vld [vmem:[%s3612_s0 + $0x130] sm:$0xff]  ;;  %v859_v3 = vld [vmem:[%s3610_s2 + $0x178] sm:$0xff] }
 0x14f   :  { %v67_v13 = vld [vmem:[%s3612_s0 + $0x138] sm:$0xff]  ;;  %v752_v17 = vmul.f32 %v2863_v33, %v66_v11 }
 0x150   :  { %v1581_v26 = vmax.f32 %v1483_v49, 0.0  ;;  %2348 = vmatprep.subr.bf16.mxu1 %v2347_v18  ;;  %v1534_v57 = vmax.f32 %v1436_v25, 0.0  ;;  %v888_v25 = vld [vmem:[%s3610_s2 + $0x260] sm:$0xff] }
 0x151   :  { %v1243_v27 = vpop.permute.xlu1 %1242  ;;  %v1098_v6 = vpop.permute.xlu0 %1097 }
 0x152   :  { %v1437_v7 = vadd.f32 %v1098_v6, %v751_v4  ;;  %541 = vperm.xlu1 %2417, %v189_v28   ;;  %536 = vperm.xlu0 %2416, %v188_v9   ;;  %v2375_v29 = vpack.c.bf16 %v1581_v26, %v1580_v21  ;;  %v1466_v37 = vadd.f32 %v1243_v27, %v780_v14  ;;  %v96_v4 = vld [vmem:[%s3612_s0 + $0x220] sm:$0xff]  ;;  %v889_v21 = vld [vmem:[%s3610_s2 + $0x268] sm:$0xff] }
 0x153   :  { %v753_v26 = vmul.f32 %v2861_v30, %v67_v13  ;;  %v97_v6 = vld [vmem:[%s3612_s0 + $0x228] sm:$0xff]  ;;  %v220_v30 = vld [vmem:[%s3609_s1 + $0x2f0] sm:$0xff]  ;;  %v68_v13 = vld [vmem:[%s3612_s0 + $0x140] sm:$0xff] }
 0x154   :  { %v1535_v38 = vmax.f32 %v1437_v7, 0.0  ;;  %2376 = vmatprep.subr.bf16.mxu0 %v2375_v29  ;;  %v1564_v56 = vmax.f32 %v1466_v37, 0.0 }
 0x155   :  { %v497_v44 = vpop.permute.xlu1 %496  ;;  %v1248_v41 = vpop.permute.xlu0 %1247 }
 0x156   :  { %v2349_v16 = vpack.c.bf16 %v1535_v38, %v1534_v57  ;;  %v1467_v8 = vadd.f32 %v1248_v41, %v781_v48  ;;  %691 = vperm.xlu1 %2417, %v219_v34   ;;  %686 = vperm.xlu0 %2416, %v218_v22   ;;  %v768_v12 = vmul.f32 %v497_v44, %v82_v51  ;;  %v221_v48 = vld [vmem:[%s3609_s1 + $0x2f8] sm:$0xff] }
 0x158   :  { %v1565_v46 = vmax.f32 %v1467_v8, 0.0  ;;  %2350 = vmatpush3.bf16.msra.mxu1 %v2349_v16  ;;  %v1599_v8 = vld [vmem:[%s3611_s3 + $0x18] sm:$0xff] }
 0x159   :  { %v647_v47 = vpop.permute.xlu1 %646  ;;  %v502_v40 = vpop.permute.xlu0 %501  ;;  %1810 = vmatprep.mubr.f32.mxu1 %v1599_v8 }
 0x15a   :  { %v2377_v50 = vpack.c.bf16 %v1565_v46, %v1564_v56  ;;  %461 = vperm.xlu1 %2417, %v173_v42   ;;  %456 = vperm.xlu0 %2416, %v172_v1   ;;  %v769_v61 = vmul.f32 %v502_v40, %v83_v36  ;;  %v798_v52 = vmul.f32 %v647_v47, %v112_v58  ;;  %v205_v56 = vld [vmem:[%s3609_s1 + $0x278] sm:$0xff]  ;;  %v204_v46 = vld [vmem:[%s3609_s1 + $0x270] sm:$0xff] }
 0x15b   :  { %v890_v36 = vld [vmem:[%s3610_s2 + $0x270] sm:$0xff] }
 0x15c   :  { %2378 = vmatpush3.bf16.msra.mxu0 %v2377_v50 }
 0x15d   :  { %v567_v43 = vpop.permute.xlu1 %566  ;;  %v652_v15 = vpop.permute.xlu0 %651 }
 0x15e   :  { %611 = vperm.xlu1 %2417, %v203_v0   ;;  %606 = vperm.xlu0 %2416, %v202_v24   ;;  %v799_v5 = vmul.f32 %v652_v15, %v113_v63  ;;  %v782_v29 = vmul.f32 %v567_v43, %v96_v4  ;;  %v907_v43 = vld [vmem:[%s3610_s2 + $0x2f8] sm:$0xff]  ;;  %v906_v15 = vld [vmem:[%s3610_s2 + $0x2f0] sm:$0xff] }
 0x15f   :  { %v114_v63 = vld [vmem:[%s3612_s0 + $0x2b0] sm:$0xff] }
 0x161   :  { %v1183_v53 = vpop.permute.xlu1 %1182  ;;  %v572_v23 = vpop.permute.xlu0 %571 }
 0x162   :  { %1227 = vperm.xlu1 %2417, %v875_v54   ;;  %1222 = vperm.xlu0 %2416, %v874_v55   ;;  %v1454_v62 = vadd.f32 %v1183_v53, %v768_v12  ;;  %v783_v57 = vmul.f32 %v572_v23, %v97_v6  ;;  %v891_v55 = vld [vmem:[%s3610_s2 + $0x278] sm:$0xff]  ;;  %v84_v53 = vld [vmem:[%s3612_s0 + $0x1c0] sm:$0xff]  ;;  %v85_v23 = vld [vmem:[%s3612_s0 + $0x1c8] sm:$0xff] }
 0x164   :  { %v1552_v31 = vmax.f32 %v1454_v62, 0.0 }
 0x165   :  { %v1333_v32 = vpop.permute.xlu1 %1332  ;;  %v1188_v2 = vpop.permute.xlu0 %1187 }
 0x166   :  { %v1455_v35 = vadd.f32 %v1188_v2, %v769_v61  ;;  %1377 = vperm.xlu1 %2417, %v905_v59   ;;  %1372 = vperm.xlu0 %2416, %v904_v39   ;;  %v1484_v20 = vadd.f32 %v1333_v32, %v798_v52  ;;  %v223_v59 = vld [vmem:[%s3609_s1 + $0x308] sm:$0xff]  ;;  %v222_v39 = vld [vmem:[%s3609_s1 + $0x300] sm:$0xff]  ;;  %v115_v32 = vld [vmem:[%s3612_s0 + $0x2b8] sm:$0xff] }
 0x168   :  { %v1553_v10 = vmax.f32 %v1455_v35, 0.0  ;;  %v1582_v19 = vmax.f32 %v1484_v20, 0.0 }
 0x169   :  { %v1103_v49 = vpop.permute.xlu1 %1102  ;;  %v1338_v18 = vpop.permute.xlu0 %1337 }
 0x16a   :  { %v2351_v28 = vpack.c.bf16 %v1553_v10, %v1552_v31  ;;  %v1485_v9 = vadd.f32 %v1338_v18, %v799_v5  ;;  %1147 = vperm.xlu1 %2417, %v859_v3   ;;  %1142 = vperm.xlu0 %2416, %v858_v60   ;;  %v1438_v33 = vadd.f32 %v1103_v49, %v752_v17  ;;  %v909_v3 = vld [vmem:[%s3610_s2 + $0x308] sm:$0xff]  ;;  %v908_v60 = vld [vmem:[%s3610_s2 + $0x300] sm:$0xff] }
 0x16b   :  { %v69_v49 = vld [vmem:[%s3612_s0 + $0x148] sm:$0xff] }
 0x16c   :  { %v1583_v27 = vmax.f32 %v1485_v9, 0.0  ;;  %2352 = vmatprep.subr.bf16.mxu1 %v2351_v28  ;;  %v1536_v37 = vmax.f32 %v1438_v33, 0.0  ;;  %v1601_v28 = vld [vmem:[%s3611_s3 + $0x28] sm:$0xff] }
 0x16d   :  { %v1253_v14 = vpop.permute.xlu1 %1252  ;;  %v1108_v7 = vpop.permute.xlu0 %1107  ;;  %1895 = vmatprep.mubr.f32.mxu0 %v1601_v28 }
 0x16e   :  { %v2379_v34 = vpack.c.bf16 %v1583_v27, %v1582_v19  ;;  %v1439_v22 = vadd.f32 %v1108_v7, %v753_v26  ;;  %1297 = vperm.xlu1 %2417, %v889_v21   ;;  %1292 = vperm.xlu0 %2416, %v888_v25   ;;  %v1468_v38 = vadd.f32 %v1253_v14, %v782_v29  ;;  %v1625_v25 = vld [vmem:[%s3613_s4 + $0x8] sm:$0xff]  ;;  %v1624_v26 = vld [vmem:[%s3613_s4] sm:$0xff]  ;;  %v99_v14 = vld [vmem:[%s3612_s0 + $0x238] sm:$0xff] }
 0x16f   :  { %v754_v19 = vmul.f32 %v2877_v45, %v68_v13  ;;  %v98_v7 = vld [vmem:[%s3612_s0 + $0x230] sm:$0xff]  ;;  %v1627_v45 = vld [vmem:[%s3613_s4 + $0x18] sm:$0xff] }
 0x170   :  { %v1537_v44 = vmax.f32 %v1439_v22, 0.0  ;;  %2380 = vmatprep.subr.bf16.mxu0 %v2379_v34  ;;  %v1566_v47 = vmax.f32 %v1468_v38, 0.0 }
 0x171   :  { %v507_v41 = vpop.permute.xlu1 %506  ;;  %v1258_v16 = vpop.permute.xlu0 %1257 }
 0x172   :  { %v2353_v42 = vpack.c.bf16 %v1537_v44, %v1536_v37  ;;  %v1469_v1 = vadd.f32 %v1258_v16, %v783_v57  ;;  %701 = vperm.xlu1 %2417, %v221_v48   ;;  %696 = vperm.xlu0 %2416, %v220_v30   ;;  %v770_v61 = vmul.f32 %v507_v41, %v84_v53  ;;  %v1626_v57 = vld [vmem:[%s3613_s4 + $0x10] sm:$0xff] }
 0x173   :  { %v86_v53 = vld [vmem:[%s3612_s0 + $0x1d0] sm:$0xff] }
 0x174   :  { %v1567_v40 = vmax.f32 %v1469_v1, 0.0  ;;  %2354 = vmatpush3.bf16.msra.mxu1 %v2353_v42 }
 0x175   :  { %v657_v50 = vpop.permute.xlu1 %656  ;;  %v512_v0 = vpop.permute.xlu0 %511 }
 0x176   :  { %v2381_v24 = vpack.c.bf16 %v1567_v40, %v1566_v47  ;;  %621 = vperm.xlu1 %2417, %v205_v56   ;;  %616 = vperm.xlu0 %2416, %v204_v46   ;;  %v771_v62 = vmul.f32 %v512_v0, %v85_v23  ;;  %v800_v5 = vmul.f32 %v657_v50, %v114_v63  ;;  %v2003_v46 = vld [vmem:[%s3614_s6] sm:$0xff]  ;;  %v2004_v47 = vld [vmem:[%s3614_s6 + $0x8] sm:$0x3] }
 0x178   :  { %2382 = vmatpush3.bf16.msra.mxu0 %v2381_v24 }
 0x179   :  { %v432_v51 = vpop.permute.xlu1 %431  ;;  %v662_v54 = vpop.permute.xlu0 %661 }
 0x17a   :  { %1387 = vperm.xlu1 %2417, %v907_v43   ;;  %1382 = vperm.xlu0 %2416, %v906_v15   ;;  %v801_v31 = vmul.f32 %v662_v54, %v115_v32  ;;  %v755_v33 = vmul.f32 %v432_v51, %v69_v49 }
 0x17d   :  { %v582_v12 = vpop.permute.xlu1 %581  ;;  %v577_v58 = vpop.permute.xlu0 %576 }
 0x17e   :  { %1307 = vperm.xlu1 %2417, %v891_v55   ;;  %1302 = vperm.xlu0 %2416, %v890_v36   ;;  %v785_v37 = vmul.f32 %v582_v12, %v99_v14  ;;  %v784_v38 = vmul.f32 %v577_v58, %v98_v7  ;;  %v87_v36 = vld [vmem:[%s3612_s0 + $0x1d8] sm:$0xff] }
 0x181   :  { %v1198_v2 = vpop.permute.xlu1 %1197  ;;  %v1193_v52 = vpop.permute.xlu0 %1192 }
 0x182   :  { %v1457_v35 = vadd.f32 %v1198_v2, %v771_v62  ;;  %v1456_v11 = vadd.f32 %v1193_v52, %v770_v61  ;;  %711 = vperm.xlu1 %2417, %v223_v59   ;;  %706 = vperm.xlu0 %2416, %v222_v39   ;;  %v117_v39 = vld [vmem:[%s3612_s0 + $0x2c8] sm:$0xff]  ;;  %v116_v61 = vld [vmem:[%s3612_s0 + $0x2c0] sm:$0xff] }
 0x184   :  { %v1555_v20 = vmax.f32 %v1457_v35, 0.0  ;;  %v1554_v10 = vmax.f32 %v1456_v11, 0.0 }
 0x185   :  { %v1348_v18 = vpop.permute.xlu1 %1347  ;;  %v1343_v17 = vpop.permute.xlu0 %1342 }
 0x186   :  { %v2355_v9 = vpack.c.bf16 %v1555_v20, %v1554_v10  ;;  %v1487_v4 = vadd.f32 %v1348_v18, %v801_v31  ;;  %v1486_v21 = vadd.f32 %v1343_v17, %v800_v5  ;;  %1397 = vperm.xlu1 %2417, %v909_v3   ;;  %1392 = vperm.xlu0 %2416, %v908_v60   ;;  %v71_v60 = vld [vmem:[%s3612_s0 + $0x158] sm:$0xff]  ;;  %v70_v5 = vld [vmem:[%s3612_s0 + $0x150] sm:$0xff] }
 0x188   :  { %v1585_v27 = vmax.f32 %v1487_v4, 0.0  ;;  %v1584_v6 = vmax.f32 %v1486_v21, 0.0  ;;  %2356 = vmatprep.subr.bf16.mxu1 %v2355_v9  ;;  %v101_v4 = vld [vmem:[%s3612_s0 + $0x248] sm:$0xff]  ;;  %v100_v21 = vld [vmem:[%s3612_s0 + $0x240] sm:$0xff] }
 0x189   :  { %v1118_v29 = vpop.permute.xlu1 %1117  ;;  %v1113_v34 = vpop.permute.xlu0 %1112 }
 0x18a   :  { %v2383_v22 = vpack.c.bf16 %v1585_v27, %v1584_v6  ;;  %v1441_v48 = vadd.f32 %v1118_v29, %v755_v33  ;;  %v1440_v30 = vadd.f32 %v1113_v34, %v754_v19  ;;  %1635 = vperm.xlu1 %2417, %v1625_v25   ;;  %1630 = vperm.xlu0 %2416, %v1624_v26  }
 0x18c   :  { %v1539_v44 = vmax.f32 %v1441_v48, 0.0  ;;  %v1538_v41 = vmax.f32 %v1440_v30, 0.0  ;;  %2384 = vmatprep.subr.bf16.mxu0 %v2383_v22 }
 0x18d   :  { %v1268_v16 = vpop.permute.xlu1 %1267  ;;  %v1263_v8 = vpop.permute.xlu0 %1262 }
 0x18e   :  { %v2357_v42 = vpack.c.bf16 %v1539_v44, %v1538_v41  ;;  %v1471_v1 = vadd.f32 %v1268_v16, %v785_v37  ;;  %v1470_v56 = vadd.f32 %v1263_v8, %v784_v38  ;;  %1645 = vperm.xlu1 %2417, %v1627_v45   ;;  %1640 = vperm.xlu0 %2416, %v1626_v57  }
 0x190   :  { %v1569_v40 = vmax.f32 %v1471_v1, 0.0  ;;  %v1568_v50 = vmax.f32 %v1470_v56, 0.0  ;;  %2358 = vmatpush3.bf16.msra.mxu1 %v2357_v42  ;;  %v89_v56 = vld [vmem:[%s3612_s0 + $0x1e8] sm:$0xff] }
 0x191   :  { %v522_v0 = vpop.permute.xlu1 %521  ;;  %v517_v24 = vpop.permute.xlu0 %516 }
 0x192   :  { %v2385_v43 = vpack.c.bf16 %v1569_v40, %v1568_v50  ;;  %2007 = vperm.xlu1 %2417, %v2003_v46   ;;  %2012 = vperm.xlu0 %2416, %v2004_v47   ;;  %v773_v58 = vmul.f32 %v522_v0, %v87_v36  ;;  %v772_v59 = vmul.f32 %v517_v24, %v86_v53  ;;  %v88_v46 = vld [vmem:[%s3612_s0 + $0x1e0] sm:$0xff]  ;;  %v119_v24 = vld [vmem:[%s3612_s0 + $0x2d8] sm:$0xff] }
 0x194   :  { %2386 = vmatpush3.bf16.msra.mxu0 %v2385_v43  ;;  %v118_v43 = vld [vmem:[%s3612_s0 + $0x2d0] sm:$0xff] }
 0x195   :  { %v672_v15 = vpop.permute.xlu1 %671  ;;  %v667_v51 = vpop.permute.xlu0 %666 }
 0x196   :  { %v803_v52 = vmul.f32 %v672_v15, %v117_v39  ;;  %v802_v35 = vmul.f32 %v667_v51, %v116_v61 }
 0x199   :  { %v442_v54 = vpop.permute.xlu1 %441  ;;  %v437_v55 = vpop.permute.xlu0 %436 }
 0x19a   :  { %v757_v18 = vmul.f32 %v442_v54, %v71_v60  ;;  %v756_v17 = vmul.f32 %v437_v55, %v70_v5  ;;  %v102_v60 = vld [vmem:[%s3612_s0 + $0x250] sm:$0xff] }
 0x19d   :  { %v592_v23 = vpop.permute.xlu1 %591  ;;  %v587_v12 = vpop.permute.xlu0 %586 }
 0x19e   :  { %v787_v6 = vmul.f32 %v592_v23, %v101_v4  ;;  %v786_v14 = vmul.f32 %v587_v12, %v100_v21 }
 0x1a1   :  { %v1208_v62 = vpop.permute.xlu1 %1207  ;;  %v1203_v63 = vpop.permute.xlu0 %1202 }
 0x1a2   :  { %v1459_v32 = vadd.f32 %v1208_v62, %v773_v58  ;;  %v1458_v2 = vadd.f32 %v1203_v63, %v772_v59  ;;  %v73_v58 = vld [vmem:[%s3612_s0 + $0x168] sm:$0xff]  ;;  %v72_v59 = vld [vmem:[%s3612_s0 + $0x160] sm:$0xff] }
 0x1a4   :  { %v1557_v11 = vmax.f32 %v1459_v32, 0.0  ;;  %v1556_v3 = vmax.f32 %v1458_v2, 0.0 }
 0x1a5   :  { %v1358_v31 = vpop.permute.xlu1 %1357  ;;  %v1353_v20 = vpop.permute.xlu0 %1352 }
 0x1a6   :  { %v2359_v10 = vpack.c.bf16 %v1557_v11, %v1556_v3  ;;  %v1489_v13 = vadd.f32 %v1358_v31, %v803_v52  ;;  %v1488_v49 = vadd.f32 %v1353_v20, %v802_v35  ;;  %v103_v3 = vld [vmem:[%s3612_s0 + $0x258] sm:$0xff] }
 0x1a8   :  { %v1587_v28 = vmax.f32 %v1489_v13, 0.0  ;;  %v1586_v9 = vmax.f32 %v1488_v49, 0.0  ;;  %2360 = vmatprep.subr.bf16.mxu1 %v2359_v10 }
 0x1a9   :  { %v1128_v25 = vpop.permute.xlu1 %1127  ;;  %v1123_v26 = vpop.permute.xlu0 %1122 }
 0x1aa   :  { %v2387_v19 = vpack.c.bf16 %v1587_v28, %v1586_v9  ;;  %v1443_v33 = vadd.f32 %v1128_v25, %v757_v18  ;;  %v1442_v27 = vadd.f32 %v1123_v26, %v756_v17 }
 0x1ac   :  { %v1541_v7 = vmax.f32 %v1443_v33, 0.0  ;;  %v1540_v29 = vmax.f32 %v1442_v27, 0.0  ;;  %2388 = vmatprep.subr.bf16.mxu0 %v2387_v19 }
 0x1ad   :  { %v1278_v34 = vpop.permute.xlu1 %1277  ;;  %v1273_v22 = vpop.permute.xlu0 %1272 }
 0x1ae   :  { %v2361_v48 = vpack.c.bf16 %v1541_v7, %v1540_v29  ;;  %v1473_v30 = vadd.f32 %v1278_v34, %v787_v6  ;;  %v1472_v45 = vadd.f32 %v1273_v22, %v786_v14 }
 0x1b0   :  { %v1571_v57 = vmax.f32 %v1473_v30, 0.0  ;;  %v1570_v37 = vmax.f32 %v1472_v45, 0.0  ;;  %2362 = vmatpush3.bf16.msra.mxu1 %v2361_v48  ;;  %v91_v48 = vld [vmem:[%s3612_s0 + $0x1f8] sm:$0xff]  ;;  %v90_v30 = vld [vmem:[%s3612_s0 + $0x1f0] sm:$0xff] }
 0x1b1   :  { %v532_v38 = vpop.permute.xlu1 %531  ;;  %v527_v44 = vpop.permute.xlu0 %526 }
 0x1b2   :  { %v2389_v41 = vpack.c.bf16 %v1571_v57, %v1570_v37  ;;  %v775_v50 = vmul.f32 %v532_v38, %v89_v56  ;;  %v774_v0 = vmul.f32 %v527_v44, %v88_v46  ;;  %v121_v44 = vld [vmem:[%s3612_s0 + $0x2e8] sm:$0xff] }
 0x1b4   :  { %2390 = vmatpush3.bf16.msra.mxu0 %v2389_v41  ;;  %v120_v41 = vld [vmem:[%s3612_s0 + $0x2e0] sm:$0xff] }
 0x1b5   :  { %v682_v16 = vpop.permute.xlu1 %681  ;;  %v677_v8 = vpop.permute.xlu0 %676 }
 0x1b6   :  { %v805_v36 = vmul.f32 %v682_v16, %v119_v24  ;;  %v804_v53 = vmul.f32 %v677_v8, %v118_v43 }
 0x1b9   :  { %v452_v42 = vpop.permute.xlu1 %451  ;;  %v447_v1 = vpop.permute.xlu0 %446 }
 0x1ba   :  { %v759_v2 = vmul.f32 %v452_v42, %v73_v58  ;;  %v758_v52 = vmul.f32 %v447_v1, %v72_v59  ;;  %v104_v58 = vld [vmem:[%s3612_s0 + $0x260] sm:$0xff] }
 0x1bd   :  { %v602_v47 = vpop.permute.xlu1 %601  ;;  %v597_v40 = vpop.permute.xlu0 %596 }
 0x1be   :  { %v789_v49 = vmul.f32 %v602_v47, %v103_v3  ;;  %v788_v18 = vmul.f32 %v597_v40, %v102_v60 }
 0x1c1   :  { %v1218_v15 = vpop.permute.xlu1 %1217  ;;  %v1213_v51 = vpop.permute.xlu0 %1212 }
 0x1c2   :  { %v1461_v54 = vadd.f32 %v1218_v15, %v775_v50  ;;  %v1460_v55 = vadd.f32 %v1213_v51, %v774_v0  ;;  %v75_v50 = vld [vmem:[%s3612_s0 + $0x178] sm:$0xff]  ;;  %v74_v0 = vld [vmem:[%s3612_s0 + $0x170] sm:$0xff] }
 0x1c4   :  { %v1559_v23 = vmax.f32 %v1461_v54, 0.0  ;;  %v1558_v12 = vmax.f32 %v1460_v55, 0.0 }
 0x1c5   :  { %v1368_v39 = vpop.permute.xlu1 %1367  ;;  %v1363_v61 = vpop.permute.xlu0 %1362 }
 0x1c6   :  { %v2363_v62 = vpack.c.bf16 %v1559_v23, %v1558_v12  ;;  %v1491_v63 = vadd.f32 %v1368_v39, %v805_v36  ;;  %v1490_v32 = vadd.f32 %v1363_v61, %v804_v53  ;;  %v105_v12 = vld [vmem:[%s3612_s0 + $0x268] sm:$0xff] }
 0x1c8   :  { %v1589_v35 = vmax.f32 %v1491_v63, 0.0  ;;  %v1588_v11 = vmax.f32 %v1490_v32, 0.0  ;;  %2364 = vmatprep.subr.bf16.mxu1 %v2363_v62 }
 0x1c9   :  { %v1138_v5 = vpop.permute.xlu1 %1137  ;;  %v1133_v31 = vpop.permute.xlu0 %1132 }
 0x1ca   :  { %v2391_v20 = vpack.c.bf16 %v1589_v35, %v1588_v11  ;;  %v1445_v10 = vadd.f32 %v1138_v5, %v759_v2  ;;  %v1444_v13 = vadd.f32 %v1133_v31, %v758_v52 }
 0x1cc   :  { %v1543_v17 = vmax.f32 %v1445_v10, 0.0  ;;  %v1542_v28 = vmax.f32 %v1444_v13, 0.0  ;;  %2392 = vmatprep.subr.bf16.mxu0 %v2391_v20  ;;  %v1598_v13 = vld [vmem:[%s3611_s3 + $0x10] sm:$0xff] }
 0x1cd   :  { %v1288_v9 = vpop.permute.xlu1 %1287  ;;  %v1283_v4 = vpop.permute.xlu0 %1282 }
 0x1ce   :  { %v2365_v21 = vpack.c.bf16 %v1543_v17, %v1542_v28  ;;  %v1475_v25 = vadd.f32 %v1288_v9, %v789_v49  ;;  %v1474_v26 = vadd.f32 %v1283_v4, %v788_v18  ;;  %v1606_v17 = vld [vmem:[%s3611_s3 + $0x50] sm:$0xff]  ;;  %v1605_v9 = vld [vmem:[%s3611_s3 + $0x48] sm:$0xff]  ;;  %v123_v4 = vld [vmem:[%s3612_s0 + $0x2f8] sm:$0xff] }
 0x1d0   :  { %v1573_v19 = vmax.f32 %v1475_v25, 0.0  ;;  %v1572_v33 = vmax.f32 %v1474_v26, 0.0  ;;  %2366 = vmatpush3.bf16.msra.mxu1 %v2365_v21  ;;  %v122_v21 = vld [vmem:[%s3612_s0 + $0x2f0] sm:$0xff] }
 0x1d1   :  { %v542_v27 = vpop.permute.xlu1 %541  ;;  %v537_v6 = vpop.permute.xlu0 %536 }
 0x1d2   :  { %v2393_v14 = vpack.c.bf16 %v1573_v19, %v1572_v33  ;;  %v777_v37 = vmul.f32 %v542_v27, %v91_v48  ;;  %v776_v38 = vmul.f32 %v537_v6, %v90_v30  ;;  %v1613_v19 = vld [vmem:[%s3611_s3 + $0x88] sm:$0xff] }
 0x1d4   :  { %2394 = vmatpush3.bf16.msra.mxu0 %v2393_v14 }
 0x1d5   :  { %v692_v7 = vpop.permute.xlu1 %691  ;;  %v687_v29 = vpop.permute.xlu0 %686 }
 0x1d6   :  { %v807_v56 = vmul.f32 %v692_v7, %v121_v44  ;;  %v806_v46 = vmul.f32 %v687_v29, %v120_v41  ;;  %v107_v7 = vld [vmem:[%s3612_s0 + $0x278] sm:$0xff]  ;;  %v1612_v29 = vld [vmem:[%s3611_s3 + $0x80] sm:$0xff] }
 0x1d9   :  { %v462_v34 = vpop.permute.xlu1 %461  ;;  %v457_v22 = vpop.permute.xlu0 %456 }
 0x1da   :  { %v761_v55 = vmul.f32 %v462_v34, %v75_v50  ;;  %v760_v36 = vmul.f32 %v457_v22, %v74_v0  ;;  %v106_v22 = vld [vmem:[%s3612_s0 + $0x270] sm:$0xff] }
 0x1dd   :  { %v612_v45 = vpop.permute.xlu1 %611  ;;  %v607_v57 = vpop.permute.xlu0 %606 }
 0x1de   :  { %v791_v32 = vmul.f32 %v612_v45, %v105_v12  ;;  %v790_v2 = vmul.f32 %v607_v57, %v104_v58  ;;  %v1620_v45 = vld [vmem:[%s3611_s3 + $0xc0] sm:$0xff] }
 0x1df   :  { %v124_v12 = vld [vmem:[%s3612_s0 + $0x300] sm:$0xff] }
 0x1e1   :  { %v1228_v16 = vpop.permute.xlu1 %1227  ;;  %v1223_v8 = vpop.permute.xlu0 %1222 }
 0x1e2   :  { %v1463_v42 = vadd.f32 %v1228_v16, %v777_v37  ;;  %v1462_v1 = vadd.f32 %v1223_v8, %v776_v38 }
 0x1e4   :  { %v1561_v47 = vmax.f32 %v1463_v42, 0.0  ;;  %v1560_v40 = vmax.f32 %v1462_v1, 0.0  ;;  %v1619_v1 = vld [vmem:[%s3611_s3 + $0xb8] sm:$0xff] }
 0x1e5   :  { %v1378_v24 = vpop.permute.xlu1 %1377  ;;  %v1373_v43 = vpop.permute.xlu0 %1372 }
 0x1e6   :  { %v2367_v15 = vpack.c.bf16 %v1561_v47, %v1560_v40  ;;  %v1493_v51 = vadd.f32 %v1378_v24, %v807_v56  ;;  %v1492_v54 = vadd.f32 %v1373_v43, %v806_v46  ;;  %v1602_v40 = vld [vmem:[%s3611_s3 + $0x30] sm:$0xff] }
 0x1e8   :  { %v1591_v53 = vmax.f32 %v1493_v51, 0.0  ;;  %v1590_v23 = vmax.f32 %v1492_v54, 0.0  ;;  %2368 = vmatprep.subr.bf16.mxu1 %v2367_v15 }
 0x1e9   :  { %v1148_v59 = vpop.permute.xlu1 %1147  ;;  %v1143_v39 = vpop.permute.xlu0 %1142 }
 0x1ea   :  { %v2395_v61 = vpack.c.bf16 %v1591_v53, %v1590_v23  ;;  %v1447_v62 = vadd.f32 %v1148_v59, %v761_v55  ;;  %v1446_v63 = vadd.f32 %v1143_v39, %v760_v36  ;;  %v125_v53 = vld [vmem:[%s3612_s0 + $0x308] sm:$0xff] }
 0x1ec   :  { %v1545_v52 = vmax.f32 %v1447_v62, 0.0  ;;  %v1544_v35 = vmax.f32 %v1446_v63, 0.0  ;;  %2396 = vmatprep.subr.bf16.mxu0 %v2395_v61  ;;  %v1600_v63 = vld [vmem:[%s3611_s3 + $0x20] sm:$0xff] }
 0x1ed   :  { %v1298_v11 = vpop.permute.xlu1 %1297  ;;  %v1293_v3 = vpop.permute.xlu0 %1292 }
 0x1ee   :  { %v2369_v60 = vpack.c.bf16 %v1545_v52, %v1544_v35  ;;  %v1477_v5 = vadd.f32 %v1298_v11, %v791_v32  ;;  %v1476_v31 = vadd.f32 %v1293_v3, %v790_v2  ;;  %v1608_v35 = vld [vmem:[%s3611_s3 + $0x60] sm:$0xff] }
 0x1f0   :  { %v1575_v20 = vmax.f32 %v1477_v5, 0.0  ;;  %v1574_v10 = vmax.f32 %v1476_v31, 0.0  ;;  %2370 = vmatpush3.bf16.msra.mxu1 %v2369_v60  ;;  %v1607_v31 = vld [vmem:[%s3611_s3 + $0x58] sm:$0xff] }
 0x1f1   :  { %v702_v49 = vpop.permute.xlu1 %701  ;;  %v697_v18 = vpop.permute.xlu0 %696 }
 0x1f2   :  { %v2397_v28 = vpack.c.bf16 %v1575_v20, %v1574_v10  ;;  %v809_v6 = vmul.f32 %v702_v49, %v123_v4  ;;  %v808_v14 = vmul.f32 %v697_v18, %v122_v21  ;;  %v1615_v20 = vld [vmem:[%s3611_s3 + $0x98] sm:$0xff]  ;;  %v1609_v49 = vld [vmem:[%s3611_s3 + $0x68] sm:$0xff]  ;;  %v1622_v18 = vld [vmem:[%s3611_s3 + $0xd0] sm:$0xff] }
 0x1f3   :  { %1811 = vmatmul.mubr.f32.vlgmr.msra.gmra.mrb[0].mxu1 %v1598_v13  ;;  %v1614_v13 = vld [vmem:[%s3611_s3 + $0x90] sm:$0xff]  ;;  %v2001_v4 = vld [vmem:[%s3615_s5] sm:$0xff] }
 0x1f4   :  { %2398 = vmatpush3.bf16.msra.mxu0 %v2397_v28  ;;  %1815 = vmatprep.mubr.f32.mxu1 %v1606_v17  ;;  %v1616_v17 = vld [vmem:[%s3611_s3 + $0xa0] sm:$0xff]  ;;  %v1621_v28 = vld [vmem:[%s3611_s3 + $0xc8] sm:$0xff] }
 0x1f5   :  { %v622_v25 = vpop.permute.xlu1 %621  ;;  %v617_v26 = vpop.permute.xlu0 %616 }
 0x1f6   :  { %v2174_v33 = vpop.f32.mrb[0].mxu0  ;;  %v793_v44 = vmul.f32 %v622_v25, %v107_v7  ;;  %v792_v16 = vmul.f32 %v617_v26, %v106_v22 }
 0x1f7   :  { %1816 = vmatmul.mubr.f32.gmra.mrb[2].mxu1 %v1605_v9  ;;  %v2175_v27 = vpop.f32.mrb[1].mxu0  ;;  %v1623_v9 = vld [vmem:[%s3611_s3 + $0xd8] sm:$0xff] }
 0x1f8   :  { %1820 = vmatprep.mubr.f32.mxu1 %v1613_v19  ;;  %v3529_v34 = vadd.f32 %v2175_v27, %v2174_v33 }
 0x1f9   :  { %v1388_v48 = vpop.permute.xlu1 %1387  ;;  %v1383_v30 = vpop.permute.xlu0 %1382 }
 0x1fa   :  { %v1495_v57 = vadd.f32 %v1388_v48, %v809_v6  ;;  %v1494_v37 = vadd.f32 %v1383_v30, %v808_v14  ;;  %v2177_v38 = vpop.f32.mrb[2].mxu0 }
 0x1fb   :  { %1821 = vmatmul.mubr.f32.gmra.mrb[4].mxu1 %v1612_v29  ;;  %v2178_v41 = vpop.f32.mrb[3].mxu0 }
 0x1fc   :  { %v1593_v8 = vmax.f32 %v1495_v57, 0.0  ;;  %v1592_v42 = vmax.f32 %v1494_v37, 0.0  ;;  %1825 = vmatprep.mubr.f32.mxu1 %v1620_v45  ;;  %v3540_v56 = vadd.f32 %v2178_v41, %v2177_v38 }
 0x1fd   :  { %v1308_v46 = vpop.permute.xlu1 %1307  ;;  %v1303_v47 = vpop.permute.xlu0 %1302 }
 0x1fe   :  { %v2399_v50 = vpack.c.bf16 %v1593_v8, %v1592_v42  ;;  %v1479_v0 = vadd.f32 %v1308_v46, %v793_v44  ;;  %v1478_v24 = vadd.f32 %v1303_v47, %v792_v16  ;;  %v2180_v43 = vpop.f32.mrb[4].mxu0 }
 0x1ff   :  { %1826 = vmatmul.mubr.f32.gmra.mrb[6].mxu1 %v1619_v1  ;;  %v2181_v15 = vpop.f32.mrb[5].mxu0 }
 0x200   :  { %v1577_v51 = vmax.f32 %v1479_v0, 0.0  ;;  %v1576_v54 = vmax.f32 %v1478_v24, 0.0  ;;  %2400 = vmatprep.subr.bf16.mxu0 %v2399_v50  ;;  %v2182_v55 = vadd.f32 %v2181_v15, %v2180_v43  ;;  %2290 = vmatprep.mubr.msk.f32.mxu1 %vm1648_vm0, %v1602_v40 }
 0x201   :  { %v712_v36 = vpop.permute.xlu1 %711  ;;  %v707_v23 = vpop.permute.xlu0 %706 }
 0x202   :  { %v2401_v58 = vpack.c.bf16 %v1577_v51, %v1576_v54  ;;  %v2183_v59 = vpop.f32.mrb[6].mxu0  ;;  %v811_v61 = vmul.f32 %v712_v36, %v125_v53  ;;  %v810_v62 = vmul.f32 %v707_v23, %v124_v12 }
 0x203   :  { %v2184_v39 = vpop.f32.mrb[7].mxu0 }
 0x204   :  { %2402 = vmatpush3.bf16.msra.mxu0 %v2401_v58  ;;  %v2185_v32 = vadd.f32 %v2184_v39, %v2183_v59 }
 0x205   :  { %v1398_v2 = vpop.permute.xlu1 %1397  ;;  %v1393_v52 = vpop.permute.xlu0 %1392 }
 0x206   :  { %v1497_v11 = vadd.f32 %v1398_v2, %v811_v61  ;;  %v1496_v3 = vadd.f32 %v1393_v52, %v810_v62 }
 0x207   :  { %1896 = vmatmul.mubr.f32.vlgmr.msra.gmra.mrb[8].mxu0 %v1600_v63 }
 0x208   :  { %v1595_v60 = vmax.f32 %v1497_v11, 0.0  ;;  %v1594_v5 = vmax.f32 %v1496_v3, 0.0  ;;  %1900 = vmatprep.mubr.f32.mxu0 %v1608_v35  ;;  %v2002_v11 = vld [vmem:[%s3615_s5 + $0x8] sm:$0x3] }
 0x209   :  { %v1631_v21 = vpop.permute.xlu0 %1630  ;;  %v1636_v27 = vpop.permute.xlu1 %1635 }
 0x20a   :  { %v2403_v10 = vpack.c.bf16 %v1595_v60, %v1594_v5  ;;  %v1728_v19 = vadd.f32 %v3529_v34, %v1631_v21  ;;  %v1733_v29 = vadd.f32 %v3540_v56, %v1636_v27 }
 0x20b   :  { %1901 = vmatmul.mubr.f32.gmra.mrb[10].mxu0 %v1607_v31 }
 0x20c   :  { %2404 = vmatprep.subr.bf16.mxu1 %v2403_v10  ;;  %1905 = vmatprep.mubr.f32.mxu0 %v1615_v20 }
 0x20d   :  { %2406 = vmatpush3.bf16.msra.mxu1 %v2403_v10  ;;  %v1641_v48 = vpop.permute.xlu0 %1640  ;;  %v1646_v44 = vpop.permute.xlu1 %1645 }
 0x20e   :  { %v1738_v37 = vadd.f32 %v2182_v55, %v1641_v48  ;;  %v1743_v42 = vadd.f32 %v2185_v32, %v1646_v44 }
 0x20f   :  { %1906 = vmatmul.mubr.f32.gmra.mrb[12].mxu0 %v1614_v13 }
 0x210   :  { %2291 = vmatmul.mubr.msk.f32.vlgmr.msra.gmra.mrb[8].mxu1 %vm1648_vm0, %v1609_v49  ;;  %1910 = vmatprep.mubr.f32.mxu0 %v1622_v18 }
 0x211   :  { %2293 = vmatprep.mubr.msk.f32.mxu1 %vm1648_vm0, %v1616_v17  ;;  %v2013_v3 = vpop.permute.xlu0 %2012  ;;  %v2008_v5 = vpop.permute.xlu1 %2007 }
 0x213   :  { %1911 = vmatmul.mubr.f32.gmra.mrb[14].mxu0 %v1621_v28 }
 0x214   :  { %2294 = vmatmul.mubr.msk.f32.gmra.mrb[10].mxu1 %vm1648_vm0, %v1623_v9 }
 0x215   :  { %2304 = vmatprep.mubr.msk.f32.mxu1 %vm2015_vm1, %v2001_v4 }
 0x2c6   :  { %v2218_v25 = vpop.f32.mrb[0].mxu1 }
 0x2c7   :  { %v2219_v26 = vpop.f32.mrb[1].mxu1 }
 0x2c8   :  { %v2220_v33 = vadd.f32 %v2219_v26, %v2218_v25 }
 0x2ca   :  { %v1813_v6 = vadd.f32 %v2220_v33, %v1728_v19  ;;  %v2221_v14 = vpop.f32.mrb[2].mxu1 }
 0x2cb   :  { %v2222_v7 = vpop.f32.mrb[3].mxu1 }
 0x2cc   :  { %v2223_v22 = vadd.f32 %v2222_v7, %v2221_v14 }
 0x2ce   :  { %v1818_v30 = vadd.f32 %v2223_v22, %v1733_v29  ;;  %v2224_v45 = vpop.f32.mrb[4].mxu1 }
 0x2cf   :  { %v2225_v57 = vpop.f32.mrb[5].mxu1 }
 0x2d0   :  { %v2226_v38 = vadd.f32 %v2225_v57, %v2224_v45 }
 0x2d2   :  { %v1823_v41 = vadd.f32 %v2226_v38, %v1738_v37  ;;  %v2227_v16 = vpop.f32.mrb[6].mxu1 }
 0x2d3   :  { %v2228_v8 = vpop.f32.mrb[7].mxu1 }
 0x2d4   :  { %v2229_v34 = vadd.f32 %v2228_v8, %v2227_v16 }
 0x2d6   :  { %v1828_v1 = vadd.f32 %v2229_v34, %v1743_v42 }
 0x2da   :  { %v2262_v46 = vpop.f32.mrb[8].mxu0 }
 0x2db   :  { %v2263_v47 = vpop.f32.mrb[9].mxu0 }
 0x2dc   :  { %v2264_v40 = vadd.f32 %v2263_v47, %v2262_v46 }
 0x2de   :  { %v2265_v50 = vpop.f32.mrb[10].mxu0  ;;  %v1898_v0 = vadd.f32 %v2264_v40, %v1813_v6 }
 0x2df   :  { %v2266_v56 = vpop.f32.mrb[11].mxu0 }
 0x2e0   :  { %v2267_v24 = vadd.f32 %v2266_v56, %v2265_v50 }
 0x2e2   :  { %v2268_v43 = vpop.f32.mrb[12].mxu0  ;;  %v1903_v15 = vadd.f32 %v2267_v24, %v1818_v30 }
 0x2e3   :  { %v2269_v51 = vpop.f32.mrb[13].mxu0  ;;  %v2292_v54 = vpop.f32.mrb[8].mxu1 }
 0x2e4   :  { %v2270_v55 = vadd.f32 %v2269_v51, %v2268_v43  ;;  %v1988_v36 = vadd.f32 %v2292_v54, %v1903_v15  ;;  %v1982_v53 = vpop.f32.mrb[9].mxu1 }
 0x2e5   :  { %v1983_v23 = vadd.f32 %v1982_v53, %v1898_v0 }
 0x2e6   :  { %v2271_v12 = vpop.f32.mrb[14].mxu0  ;;  %v1908_v58 = vadd.f32 %v2270_v55, %v1823_v41 }
 0x2e7   :  { %v2407_v59 = vpack.c.bf16 %v1988_v36, %v1983_v23  ;;  %v2272_v39 = vpop.f32.mrb[15].mxu0  ;;  %v2295_v61 = vpop.f32.mrb[10].mxu1 }
 0x2e8   :  { %v2273_v62 = vadd.f32 %v2272_v39, %v2271_v12  ;;  %v1992_v63 = vpop.f32.mrb[11].mxu1 }
 0x2e9   :  { %v1993_v32 = vadd.f32 %v1992_v63, %v1908_v58  ;;  %2408 = vmatprep.subr.bf16.mxu1 %v2407_v59 }
 0x2ea   :  { %v1913_v2 = vadd.f32 %v2273_v62, %v1828_v1  ;;  %2410 = vmatpush3.bf16.msra.mxu1 %v2407_v59 }
 0x2ec   :  { %v1998_v52 = vadd.f32 %v2295_v61, %v1913_v2 }
 0x2ee   :  { %v2411_v35 = vpack.c.bf16 %v1998_v52, %v1993_v32 }
 0x2f0   :  { %2412 = vmatprep.subr.bf16.mxu1 %v2411_v35 }
 0x2f1   :  { %2414 = vmatpush3.bf16.msra.mxu1 %v2411_v35 }
 0x2f4   :  { %2305 = vmatmul.mubr.msk.f32.vlgmr.msra.gmra.mrb[12].mxu1 %vm2015_vm1, %v2002_v11 }
 0x3c7   :  { %v2306_v60 = vpop.f32.mrb[12].mxu1 }
 0x3c8   :  { %v2094_v31 = vadd.f32 %v2306_v60, %v2013_v3  ;;  %v2088_v20 = vpop.f32.mrb[13].mxu1 }
 0x3c9   :  { %v2089_v10 = vadd.f32 %v2088_v20, %v2008_v5 }
 0x3ca   :  { %2098 = vst [vmem:[%s3616_s7 + $0x8] sm:$0x3] %v2094_v31  ;;  %v2100_v13 = vsel %vm2099_vm2, %v2094_v31, -inf }
 0x3cb   :  { %2097 = vst [vmem:[%s3616_s7] sm:$0xff] %v2089_v10  ;;  %v2101_v49 = vmax.f32 %v2089_v10, %v2100_v13 }
 0x3cd   :  { %v2102_v18 = vrot.slane %v2101_v49, 4 }
 0x3cf   :  { %v2103_v17 = vmax.f32 %v2101_v49, %v2102_v18 }
 0x3d1   :  { %v2104_v28 = vrot.slane %v2103_v17, 2 }
 0x3d3   :  { %v2105_v9 = vmax.f32 %v2103_v17, %v2104_v28 }
 0x3d5   :  { %v2106_v4 = vrot.slane %v2105_v9, 1 }
 0x3d7   :  { %v2107_v21 = vmax.f32 %v2105_v9, %v2106_v4 }
 0x3d9   :  { %v2108_v25 = vsub.f32 %v2089_v10, %v2107_v21  ;;  %v2109_v26 = vsub.f32 %v2094_v31, %v2107_v21 }
 0x3db   :  { %v2110_v19 = vmul.f32 1.442695, %v2108_v25  ;;  %v2112_v33 = vmul.f32 1.442695, %v2109_v26 }
 0x3dd   :  { %2418 = vpow2.f32 %v2110_v19 }
 0x3de   :  { %2420 = vpow2.f32 %v2112_v33 }
 0x3e7   :  { %v2419_v27 = vpop.eup %2418 }
 0x3e8   :  { %v2421_v6 = vpop.eup %2420 }
 0x3e9   :  { %v2114_v14 = vsel %vm2099_vm2, %v2421_v6, 0.0 }
 0x3ea   :  { %v2115_v7 = vadd.f32 %v2419_v27, %v2114_v14 }
 0x3ec   :  { %v2116_v29 = vrot.slane %v2115_v7, 4 }
 0x3ee   :  { %v2117_v22 = vadd.f32 %v2116_v29, %v2115_v7 }
 0x3f0   :  { %v2118_v48 = vrot.slane %v2117_v22, 2 }
 0x3f2   :  { %v2119_v30 = vadd.f32 %v2118_v48, %v2117_v22 }
 0x3f4   :  { %v2120_v45 = vrot.slane %v2119_v30, 1 }
 0x3f6   :  { %v2121_v57 = vadd.f32 %v2120_v45, %v2119_v30 }
 0x3f8   :  { %2422 = vlog2.f32 %v2121_v57 }
 0x402   :  { %v2423_v37 = vpop.eup %2422 }
 0x403   :  { %v2123_v38 = vmul.f32 0.6931472, %v2423_v37 }
 0x405   :  { %v2124_v44 = vsub.f32 %v2108_v25, %v2123_v38  ;;  %v2125_v41 = vsub.f32 %v2109_v26, %v2123_v38 }
 0x407   :  { %2126 = vst [vmem:[%s3617_s8] sm:$0xff] %v2124_v44  ;;  %2127 = vst [vmem:[%s3617_s8 + $0x8] sm:$0x3] %v2125_v41 }

</bundles_post_ra>
